<compile_context>
chip_gen: v6e
topology: v6e:2x2x1
jax: 0.10.0
libtpu: 0.0.40
codegen_flags: <defaults>
</compile_context>

<pallas_src>
import jax
import jax.numpy as jnp
from jax import lax
from jax.experimental import pallas as pl
from jax.experimental.pallas import tpu as pltpu

_EPS = 1e-5

# rows of the per-channel stats scratch (leading-axis indexed -> clean (F_int, 1) views)
_SUM_G, _SSQ_G, _SUM_X, _SSQ_X, _SCALE_G, _SHIFT_G, _SCALE_X, _SHIFT_X = range(8)
# rows of the psi stats scratch
_SUM_P, _SSQ_P, _SCALE_P, _SHIFT_P = range(4)


def _pick_tile_hw(hw, n, c_max, itemsize, budget_bytes=4 << 20):
    """Largest 128-multiple tile of the H*W axis that divides hw, keeps one (N, C, tile)
    block well under VMEM (budget is per block, per buffer; conservative so a double-
    buffered pipeline fits the default scoped VMEM on v5e/v6e and v7x's smaller 64 MiB),
    and leaves >= 2 grid steps so DMA overlaps compute."""
    if hw % 128 != 0 or hw < 1024:
        return hw                       # single full-extent block (still legal: full dim)
    t = max(128, (budget_bytes // max(1, n * c_max * itemsize)) // 128 * 128)
    t = min(t, max(128, (hw // 2) // 128 * 128))   # ensure >= 2 tiles
    t = min(t, hw)
    while hw % t:
        t -= 128
    return t


def _make_kernel(n_batch, m_total, t_hw, eps):
    inv_m = 1.0 / float(m_total)
    f32 = jnp.float32

    def kernel(g_ref, x_ref, wg_ref, wx_ref,
               gam_g_ref, bet_g_ref, gam_x_ref, bet_x_ref, wpsi_ref,
               pbn_ref,                       # SMEM (2,): [gamma_psi, beta_psi]
               o_ref,
               cstats, pstats, p_cache):
        phase = pl.program_id(0)
        i = pl.program_id(1)
        start = pl.multiple_of(i * t_hw, t_hw)
        f_int = wg_ref.shape[0]

        # ---------------- phase 0: per-channel stats of the pre-BN conv outputs ------
        @pl.when((phase == 0) & (i == 0))
        def _init():
            cstats[...] = jnp.zeros_like(cstats)
            pstats[...] = jnp.zeros_like(pstats)

        @pl.when(phase == 0)
        def _gx_stats():
            wg = wg_ref[...]
            wx = wx_ref[...]
            sg = jnp.zeros((f_int, 1), f32)
            qg = jnp.zeros((f_int, 1), f32)
            sx = jnp.zeros((f_int, 1), f32)
            qx = jnp.zeros((f_int, 1), f32)
            for n in range(n_batch):          # static unroll over small batch
                yg = jnp.dot(wg, g_ref[n], preferred_element_type=f32)   # (F_int, t_hw)
                yx = jnp.dot(wx, x_ref[n], preferred_element_type=f32)
                sg = sg + jnp.sum(yg, axis=1, keepdims=True)
                qg = qg + jnp.sum(yg * yg, axis=1, keepdims=True)
                sx = sx + jnp.sum(yx, axis=1, keepdims=True)
                qx = qx + jnp.sum(yx * yx, axis=1, keepdims=True)
            cstats[_SUM_G] += sg
            cstats[_SSQ_G] += qg
            cstats[_SUM_X] += sx
            cstats[_SSQ_X] += qx

        # ---------------- phase 1 (first tile): fold stats into BN scale/shift -------
        @pl.when((phase == 1) & (i == 0))
        def _gx_affine():
            def affine(s_idx, q_idx, gam, bet, sc_idx, sh_idx):
                mean = cstats[s_idx] * inv_m
                # one-pass variance (required by tiled accumulation); clamp for safety.
                var = jnp.maximum(cstats[q_idx] * inv_m - mean * mean, 0.0)
                scale = gam * lax.rsqrt(var + eps)          # EUP rsqrt
                cstats[sc_idx] = scale
                cstats[sh_idx] = bet - mean * scale
            affine(_SUM_G, _SSQ_G, gam_g_ref[...], bet_g_ref[...], _SCALE_G, _SHIFT_G)
            affine(_SUM_X, _SSQ_X, gam_x_ref[...], bet_x_ref[...], _SCALE_X, _SHIFT_X)

        # ---------------- phase 1: relu(g1+x1), psi conv, psi stats, psi cache --------
        @pl.when(phase == 1)
        def _psi_pre():
            wg = wg_ref[...]
            wx = wx_ref[...]
            wpsi = wpsi_ref[...]                            # (F_int, 1)
            sc_g = cstats[_SCALE_G]; sh_g = cstats[_SHIFT_G]
            sc_x = cstats[_SCALE_X]; sh_x = cstats[_SHIFT_X]
            ps = jnp.zeros((1, 1), f32)
            pq = jnp.zeros((1, 1), f32)
            for n in range(n_batch):
                yg = jnp.dot(wg, g_ref[n], preferred_element_type=f32)
                yx = jnp.dot(wx, x_ref[n], preferred_element_type=f32)
                s = jnp.maximum(yg * sc_g + sh_g + yx * sc_x + sh_x, 0.0)
                # psi 1x1 conv (F_int -> 1): weighted sublane reduce (XLU), MXU not needed.
                p = jnp.sum(s * wpsi, axis=0, keepdims=True)        # (1, t_hw)
                p_cache[pl.ds(n, 1), pl.ds(start, t_hw)] = p
                ps = ps + jnp.sum(p, axis=1, keepdims=True)
                pq = pq + jnp.sum(p * p, axis=1, keepdims=True)
            pstats[_SUM_P] += ps
            pstats[_SSQ_P] += pq

        # ---------------- phase 2 (first tile): psi BN scale/shift --------------------
        @pl.when((phase == 2) & (i == 0))
        def _psi_affine():
            mean = pstats[_SUM_P] * inv_m
            var = jnp.maximum(pstats[_SSQ_P] * inv_m - mean * mean, 0.0)
            scale = pbn_ref[0] * lax.rsqrt(var + eps)
            pstats[_SCALE_P] = scale
            pstats[_SHIFT_P] = pbn_ref[1] - mean * scale

        # ---------------- phase 2: sigmoid gate applied to x, lane-dense store --------
        @pl.when(phase == 2)
        def _gate():
            sc_p = pstats[_SCALE_P]
            sh_p = pstats[_SHIFT_P]
            for n in range(n_batch):
                p = p_cache[pl.ds(n, 1), pl.ds(start, t_hw)]        # (1, t_hw)
                pn = p * sc_p + sh_p
                sig = 0.5 * (jnp.tanh(0.5 * pn) + 1.0)              # single EUP tanh
                xn = x_ref[n].astype(f32)
                o_ref[n] = (xn * sig).astype(o_ref.dtype)           # full-width store

    return kernel


# ------------------------------------------------------------------
# Wrapper (NCHW public API; reshapes only — no transposes, no casts of g/x)
# ------------------------------------------------------------------
@jax.jit
def attention_forward(g_nchw, x_nchw, params):
    N, F_g, H, W = g_nchw.shape
    F_l = x_nchw.shape[1]
    F_int = params["wg_w"].shape[0]
    HW = H * W
    M = N * HW
    f32 = jnp.float32

    t_hw = _pick_tile_hw(HW, N, max(F_g, F_l), jnp.dtype(x_nchw.dtype).itemsize)
    nt = HW // t_hw
    last = nt - 1

    # Free reshapes; caller dtype preserved end-to-end.
    g3 = g_nchw.reshape(N, F_g, HW)
    x3 = x_nchw.reshape(N, F_l, HW)

    # Tiny parameter arrays (negligible traffic).
    wg = params["wg_w"].reshape(F_int, F_g).astype(f32)
    wx = params["wx_w"].reshape(F_int, F_l).astype(f32)
    col = lambda v: v.reshape(-1, 1).astype(f32)
    gam_g, bet_g = col(params["bn_g_gamma"]), col(params["bn_g_beta"])
    gam_x, bet_x = col(params["bn_x_gamma"]), col(params["bn_x_beta"])
    wpsi = params["psi_w"].reshape(F_int, 1).astype(f32)
    pbn = jnp.concatenate([params["bn_p_gamma"].reshape(-1),
                           params["bn_p_beta"].reshape(-1)]).astype(f32)   # (2,) SMEM
    # Conv biases (wg_b, wx_b, psi_b) intentionally not passed: exactly cancelled by the
    # training-mode BN mean subtraction.

    kernel = _make_kernel(N, M, t_hw, _EPS)

    const2 = lambda p, i: (0, 0)
    g_spec = pl.BlockSpec((N, F_g, t_hw),
                          lambda p, i: (0, 0, jnp.where(p == 2, last, i)))   # no re-read in phase 2
    x_spec = pl.BlockSpec((N, F_l, t_hw), lambda p, i: (0, 0, i))
    out_spec = pl.BlockSpec((N, F_l, t_hw),
                            lambda p, i: (0, 0, jnp.where(p == 2, i, 0)))    # write-back only in phase 2

    itemsize = jnp.dtype(x_nchw.dtype).itemsize
    flops = int(2 * 2 * M * F_int * (F_g + F_l) + M * (10 * F_int + 8))
    bytes_accessed = int(itemsize * (2 * g3.size + 3 * x3.size + F_l * M)
                         + 4 * (wg.size + wx.size + 6 * F_int + 2))

    out3 = pl.pallas_call(
        kernel,
        out_shape=jax.ShapeDtypeStruct((N, F_l, HW), x_nchw.dtype),
        grid=(3, nt),
        in_specs=[
            g_spec,
            x_spec,
            pl.BlockSpec((F_int, F_g), const2),
            pl.BlockSpec((F_int, F_l), const2),
            pl.BlockSpec((F_int, 1), const2),      # gamma_g
            pl.BlockSpec((F_int, 1), const2),      # beta_g
            pl.BlockSpec((F_int, 1), const2),      # gamma_x
            pl.BlockSpec((F_int, 1), const2),      # beta_x
            pl.BlockSpec((F_int, 1), const2),      # w_psi
            pl.BlockSpec(memory_space=pltpu.MemorySpace.SMEM),   # [gamma_psi, beta_psi]
        ],
        out_specs=out_spec,
        scratch_shapes=[
            pltpu.VMEM((8, F_int, 1), f32),        # per-channel sums / sumsq / scale / shift
            pltpu.VMEM((4, 1, 1), f32),            # psi sums / scale / shift
            pltpu.VMEM((N, HW), f32),              # cached pre-BN psi rows (1 channel)
        ],
        compiler_params=pltpu.CompilerParams(
            dimension_semantics=("arbitrary", "arbitrary")),
        cost_estimate=pl.CostEstimate(flops=flops, transcendentals=int(M),
                                      bytes_accessed=bytes_accessed),
    )(g3, x3, wg, wx, gam_g, bet_g, gam_x, bet_x, wpsi, pbn)

    return out3.reshape(N, F_l, H, W)   # free reshape back to NCHW


# ------------------------------------------------------------------
# Pure-JAX reference (NCHW, mirrors PyTorch forward semantics, biases included)
# ------------------------------------------------------------------
def ref_attention(g, x, p, eps=_EPS):
    hp = lax.Precision.HIGHEST

    def conv1x1(z, w, b):
        co, ci = w.shape[0], w.shape[1]
        y = jnp.einsum("oi,nihw->nohw", w.reshape(co, ci), z, precision=hp)
        return y + b[None, :, None, None]

    def bn(y, gamma, beta):
        mean = y.mean(axis=(0, 2, 3), keepdims=True)
        var = y.var(axis=(0, 2, 3), keepdims=True)   # biased, like PyTorch BN forward
        yhat = (y - mean) / jnp.sqrt(var + eps)
        return yhat * gamma[None, :, None, None] + beta[None, :, None, None]

    g1 = bn(conv1x1(g, p["wg_w"], p["wg_b"]), p["bn_g_gamma"], p["bn_g_beta"])
    x1 = bn(conv1x1(x, p["wx_w"], p["wx_b"]), p["bn_x_gamma"], p["bn_x_beta"])
    s = jnp.maximum(g1 + x1, 0.0)
    psi = bn(conv1x1(s, p["psi_w"], p["psi_b"]), p["bn_p_gamma"], p["bn_p_beta"])
    psi = jax.nn.sigmoid(psi)
    return x * psi


# ------------------------------------------------------------------
# Main
# ------------------------------------------------------------------
if __name__ == "__main__":
    F_g, F_l, F_int = 8, 8, 4
    N, H, W = 2, 32, 32               # H*W = 1024 -> two 512-lane tiles per phase

    key = jax.random.PRNGKey(0)
    ks = jax.random.split(key, 14)

    def nrm(k, shape, s=0.1):
        return (s * jax.random.normal(k, shape)).astype(jnp.float32)

    params = {
        # Conv2d weights in PyTorch (out, in, 1, 1) layout.
        "wg_w": nrm(ks[0], (F_int, F_g, 1, 1)),
        "wg_b": nrm(ks[1], (F_int,)),
        "bn_g_gamma": (1.0 + 0.1 * jax.random.normal(ks[2], (F_int,))).astype(jnp.float32),
        "bn_g_beta": nrm(ks[3], (F_int,)),
        "wx_w": nrm(ks[4], (F_int, F_l, 1, 1)),
        "wx_b": nrm(ks[5], (F_int,)),
        "bn_x_gamma": (1.0 + 0.1 * jax.random.normal(ks[6], (F_int,))).astype(jnp.float32),
        "bn_x_beta": nrm(ks[7], (F_int,)),
        "psi_w": nrm(ks[8], (1, F_int, 1, 1)),
        "psi_b": nrm(ks[9], (1,)),
        "bn_p_gamma": (1.0 + 0.1 * jax.random.normal(ks[10], (1,))).astype(jnp.float32),
        "bn_p_beta": nrm(ks[11], (1,)),
    }

    g = jax.random.normal(ks[12], (N, F_g, H, W), dtype=jnp.float32)
    x = jax.random.normal(ks[13], (N, F_l, H, W), dtype=jnp.float32)

    out = jax.block_until_ready(attention_forward(g, x, params))
    ref = jax.block_until_ready(ref_attention(g, x, params))

    assert out.shape == (N, F_l, H, W), out.shape
    assert out.dtype == x.dtype, out.dtype
    max_err = float(jnp.max(jnp.abs(out - ref)))
    assert max_err < 2e-3, f"mismatch vs reference: {max_err}"

    print("KERNEL_OK")
</pallas_src>

<mosaic_0001>
module attributes {stable_mosaic.version = 11 : i64} {
  func.func @kernel(%arg0: i32, %arg1: i32, %arg2: memref<2x8x512xf32, #tpu.memory_space<vmem>>, %arg3: memref<2x8x512xf32, #tpu.memory_space<vmem>>, %arg4: memref<4x8xf32, #tpu.memory_space<vmem>>, %arg5: memref<4x8xf32, #tpu.memory_space<vmem>>, %arg6: memref<4x1xf32, #tpu.memory_space<vmem>>, %arg7: memref<4x1xf32, #tpu.memory_space<vmem>>, %arg8: memref<4x1xf32, #tpu.memory_space<vmem>>, %arg9: memref<4x1xf32, #tpu.memory_space<vmem>>, %arg10: memref<4x1xf32, #tpu.memory_space<vmem>>, %arg11: memref<2xf32, #tpu.memory_space<smem>>, %arg12: memref<2x8x512xf32, #tpu.memory_space<vmem>>, %arg13: memref<8x4x1xf32, #tpu.memory_space<vmem>>, %arg14: memref<4x1x1xf32, #tpu.memory_space<vmem>>, %arg15: memref<2x1024xf32, #tpu.memory_space<vmem>>) attributes {dimension_semantics = [#tpu.dimension_semantics<arbitrary>, #tpu.dimension_semantics<arbitrary>], iteration_bounds = array<i64: 3, 2>, scalar_prefetch = 0 : i64, scratch_operands = 3 : i64, tpu.core_type = #tpu.core_type<tc>, window_params = [{transform_indices = @transform_0, window_bounds = array<i64: 2, 8, 512>}, {transform_indices = @transform_1, window_bounds = array<i64: 2, 8, 512>}, {pipeline_mode = #tpu.pipeline_mode<synchronous>, transform_indices = @transform_2, window_bounds = array<i64: 4, 8>}, {pipeline_mode = #tpu.pipeline_mode<synchronous>, transform_indices = @transform_3, window_bounds = array<i64: 4, 8>}, {pipeline_mode = #tpu.pipeline_mode<synchronous>, transform_indices = @transform_4, window_bounds = array<i64: 4, 1>}, {pipeline_mode = #tpu.pipeline_mode<synchronous>, transform_indices = @transform_5, window_bounds = array<i64: 4, 1>}, {pipeline_mode = #tpu.pipeline_mode<synchronous>, transform_indices = @transform_6, window_bounds = array<i64: 4, 1>}, {pipeline_mode = #tpu.pipeline_mode<synchronous>, transform_indices = @transform_7, window_bounds = array<i64: 4, 1>}, {pipeline_mode = #tpu.pipeline_mode<synchronous>, transform_indices = @transform_8, window_bounds = array<i64: 4, 1>}, {transform_indices = @transform_9, window_bounds = array<i64: 2>}, {transform_indices = @transform_10, window_bounds = array<i64: 2, 8, 512>}]} {
    %c512_i32 = arith.constant 512 : i32
    %0 = arith.muli %arg1, %c512_i32 : i32
    %1 = tpu.assume_multiple %0, 512 : i32
    %c0_i32 = arith.constant 0 : i32
    %2 = arith.cmpi eq, %arg0, %c0_i32 : i32
    %c0_i32_0 = arith.constant 0 : i32
    %3 = arith.cmpi eq, %arg1, %c0_i32_0 : i32
    %4 = arith.andi %2, %3 : i1
    %5 = arith.extui %4 : i1 to i32
    %c0_i32_1 = arith.constant 0 : i32
    %6 = arith.cmpi ne, %5, %c0_i32_1 : i32
    scf.if %6 {
      %cst = arith.constant 0.000000e+00 : f32
      %26 = vector.broadcast %cst : f32 to vector<8x4x1xf32>
      %c0 = arith.constant 0 : index
      %c0_12 = arith.constant 0 : index
      %c0_13 = arith.constant 0 : index
      %27 = vector.load %arg13[%c0, %c0_12, %c0_13] : memref<8x4x1xf32, #tpu.memory_space<vmem>>, vector<8x4x1xf32>
      tpu.vector_store %arg13[%c0, %c0_12, %c0_13], %26 {strides = array<i32>} : memref<8x4x1xf32, #tpu.memory_space<vmem>>, vector<8x4x1xf32>,
      %cst_14 = arith.constant 0.000000e+00 : f32
      %28 = vector.broadcast %cst_14 : f32 to vector<4x1x1xf32>
      %c0_15 = arith.constant 0 : index
      %c0_16 = arith.constant 0 : index
      %c0_17 = arith.constant 0 : index
      %29 = vector.load %arg14[%c0_15, %c0_16, %c0_17] : memref<4x1x1xf32, #tpu.memory_space<vmem>>, vector<4x1x1xf32>
      tpu.vector_store %arg14[%c0_15, %c0_16, %c0_17], %28 {strides = array<i32>} : memref<4x1x1xf32, #tpu.memory_space<vmem>>, vector<4x1x1xf32>,
    } else {
    }
    %c0_i32_2 = arith.constant 0 : i32
    %7 = arith.cmpi eq, %arg0, %c0_i32_2 : i32
    %8 = arith.extui %7 : i1 to i32
    %c0_i32_3 = arith.constant 0 : i32
    %9 = arith.cmpi ne, %8, %c0_i32_3 : i32
    scf.if %9 {
      %c0 = arith.constant 0 : index
      %c0_12 = arith.constant 0 : index
      %26 = vector.load %arg4[%c0, %c0_12] : memref<4x8xf32, #tpu.memory_space<vmem>>, vector<4x8xf32>
      %c0_13 = arith.constant 0 : index
      %c0_14 = arith.constant 0 : index
      %27 = vector.load %arg5[%c0_13, %c0_14] : memref<4x8xf32, #tpu.memory_space<vmem>>, vector<4x8xf32>
      %cst = arith.constant 0.000000e+00 : f32
      %28 = vector.broadcast %cst : f32 to vector<4x1xf32>
      %cst_15 = arith.constant 0.000000e+00 : f32
      %29 = vector.broadcast %cst_15 : f32 to vector<4x1xf32>
      %cst_16 = arith.constant 0.000000e+00 : f32
      %30 = vector.broadcast %cst_16 : f32 to vector<4x1xf32>
      %cst_17 = arith.constant 0.000000e+00 : f32
      %31 = vector.broadcast %cst_17 : f32 to vector<4x1xf32>
      %c0_18 = arith.constant 0 : index
      %c0_19 = arith.constant 0 : index
      %c0_20 = arith.constant 0 : index
      %32 = vector.load %arg2[%c0_18, %c0_19, %c0_20] : memref<2x8x512xf32, #tpu.memory_space<vmem>>, vector<1x8x512xf32>
      %33 = vector.shape_cast %32 : vector<1x8x512xf32> to vector<8x512xf32>
      %cst_21 = arith.constant dense<0.000000e+00> : vector<4x512xf32>
      %34 = tpu.matmul %26, %33, %cst_21 {dimension_numbers = #tpu.dot_dimension_numbers<[1], [0], [0], [1], [0, 0, 1, 1], [], []>} : vector<4x8xf32>, vector<8x512xf32>, vector<4x512xf32> -> vector<4x512xf32>
      %c0_22 = arith.constant 0 : index
      %c0_23 = arith.constant 0 : index
      %c0_24 = arith.constant 0 : index
      %35 = vector.load %arg3[%c0_22, %c0_23, %c0_24] : memref<2x8x512xf32, #tpu.memory_space<vmem>>, vector<1x8x512xf32>
      %36 = vector.shape_cast %35 : vector<1x8x512xf32> to vector<8x512xf32>
      %cst_25 = arith.constant dense<0.000000e+00> : vector<4x512xf32>
      %37 = tpu.matmul %27, %36, %cst_25 {dimension_numbers = #tpu.dot_dimension_numbers<[1], [0], [0], [1], [0, 0, 1, 1], [], []>} : vector<4x8xf32>, vector<8x512xf32>, vector<4x512xf32> -> vector<4x512xf32>
      %cst_26 = arith.constant dense<0.000000e+00> : vector<4xf32>
      %38 = vector.multi_reduction <add>, %34, %cst_26 [1] : vector<4x512xf32> to vector<4xf32>
      %39 = vector.shape_cast %38 : vector<4xf32> to vector<4x1xf32>
      %40 = arith.addf %28, %39 : vector<4x1xf32>
      %41 = arith.mulf %34, %34 : vector<4x512xf32>
      %cst_27 = arith.constant dense<0.000000e+00> : vector<4xf32>
      %42 = vector.multi_reduction <add>, %41, %cst_27 [1] : vector<4x512xf32> to vector<4xf32>
      %43 = vector.shape_cast %42 : vector<4xf32> to vector<4x1xf32>
      %44 = arith.addf %29, %43 : vector<4x1xf32>
      %cst_28 = arith.constant dense<0.000000e+00> : vector<4xf32>
      %45 = vector.multi_reduction <add>, %37, %cst_28 [1] : vector<4x512xf32> to vector<4xf32>
      %46 = vector.shape_cast %45 : vector<4xf32> to vector<4x1xf32>
      %47 = arith.addf %30, %46 : vector<4x1xf32>
      %48 = arith.mulf %37, %37 : vector<4x512xf32>
      %cst_29 = arith.constant dense<0.000000e+00> : vector<4xf32>
      %49 = vector.multi_reduction <add>, %48, %cst_29 [1] : vector<4x512xf32> to vector<4xf32>
      %50 = vector.shape_cast %49 : vector<4xf32> to vector<4x1xf32>
      %51 = arith.addf %31, %50 : vector<4x1xf32>
      %c1 = arith.constant 1 : index
      %c0_30 = arith.constant 0 : index
      %c0_31 = arith.constant 0 : index
      %52 = vector.load %arg2[%c1, %c0_30, %c0_31] : memref<2x8x512xf32, #tpu.memory_space<vmem>>, vector<1x8x512xf32>
      %53 = vector.shape_cast %52 : vector<1x8x512xf32> to vector<8x512xf32>
      %cst_32 = arith.constant dense<0.000000e+00> : vector<4x512xf32>
      %54 = tpu.matmul %26, %53, %cst_32 {dimension_numbers = #tpu.dot_dimension_numbers<[1], [0], [0], [1], [0, 0, 1, 1], [], []>} : vector<4x8xf32>, vector<8x512xf32>, vector<4x512xf32> -> vector<4x512xf32>
      %c1_33 = arith.constant 1 : index
      %c0_34 = arith.constant 0 : index
      %c0_35 = arith.constant 0 : index
      %55 = vector.load %arg3[%c1_33, %c0_34, %c0_35] : memref<2x8x512xf32, #tpu.memory_space<vmem>>, vector<1x8x512xf32>
      %56 = vector.shape_cast %55 : vector<1x8x512xf32> to vector<8x512xf32>
      %cst_36 = arith.constant dense<0.000000e+00> : vector<4x512xf32>
      %57 = tpu.matmul %27, %56, %cst_36 {dimension_numbers = #tpu.dot_dimension_numbers<[1], [0], [0], [1], [0, 0, 1, 1], [], []>} : vector<4x8xf32>, vector<8x512xf32>, vector<4x512xf32> -> vector<4x512xf32>
      %cst_37 = arith.constant dense<0.000000e+00> : vector<4xf32>
      %58 = vector.multi_reduction <add>, %54, %cst_37 [1] : vector<4x512xf32> to vector<4xf32>
      %59 = vector.shape_cast %58 : vector<4xf32> to vector<4x1xf32>
      %60 = arith.addf %40, %59 : vector<4x1xf32>
      %61 = arith.mulf %54, %54 : vector<4x512xf32>
      %cst_38 = arith.constant dense<0.000000e+00> : vector<4xf32>
      %62 = vector.multi_reduction <add>, %61, %cst_38 [1] : vector<4x512xf32> to vector<4xf32>
      %63 = vector.shape_cast %62 : vector<4xf32> to vector<4x1xf32>
      %64 = arith.addf %44, %63 : vector<4x1xf32>
      %cst_39 = arith.constant dense<0.000000e+00> : vector<4xf32>
      %65 = vector.multi_reduction <add>, %57, %cst_39 [1] : vector<4x512xf32> to vector<4xf32>
      %66 = vector.shape_cast %65 : vector<4xf32> to vector<4x1xf32>
      %67 = arith.addf %47, %66 : vector<4x1xf32>
      %68 = arith.mulf %57, %57 : vector<4x512xf32>
      %cst_40 = arith.constant dense<0.000000e+00> : vector<4xf32>
      %69 = vector.multi_reduction <add>, %68, %cst_40 [1] : vector<4x512xf32> to vector<4xf32>
      %70 = vector.shape_cast %69 : vector<4xf32> to vector<4x1xf32>
      %71 = arith.addf %51, %70 : vector<4x1xf32>
      %c0_41 = arith.constant 0 : index
      %c0_42 = arith.constant 0 : index
      %c0_43 = arith.constant 0 : index
      %72 = vector.load %arg13[%c0_41, %c0_42, %c0_43] : memref<8x4x1xf32, #tpu.memory_space<vmem>>, vector<1x4x1xf32>
      %73 = vector.shape_cast %72 : vector<1x4x1xf32> to vector<4x1xf32>
      %74 = arith.addf %73, %60 : vector<4x1xf32>
      %c0_44 = arith.constant 0 : index
      %c0_45 = arith.constant 0 : index
      %c0_46 = arith.constant 0 : index
      %75 = vector.load %arg13[%c0_44, %c0_45, %c0_46] : memref<8x4x1xf32, #tpu.memory_space<vmem>>, vector<1x4x1xf32>
      %76 = vector.shape_cast %75 : vector<1x4x1xf32> to vector<4x1xf32>
      %77 = vector.shape_cast %74 : vector<4x1xf32> to vector<1x4x1xf32>
      tpu.vector_store %arg13[%c0_44, %c0_45, %c0_46], %77 {strides = array<i32>} : memref<8x4x1xf32, #tpu.memory_space<vmem>>, vector<1x4x1xf32>,
      %c1_47 = arith.constant 1 : index
      %c0_48 = arith.constant 0 : index
      %c0_49 = arith.constant 0 : index
      %78 = vector.load %arg13[%c1_47, %c0_48, %c0_49] : memref<8x4x1xf32, #tpu.memory_space<vmem>>, vector<1x4x1xf32>
      %79 = vector.shape_cast %78 : vector<1x4x1xf32> to vector<4x1xf32>
      %80 = arith.addf %79, %64 : vector<4x1xf32>
      %c1_50 = arith.constant 1 : index
      %c0_51 = arith.constant 0 : index
      %c0_52 = arith.constant 0 : index
      %81 = vector.load %arg13[%c1_50, %c0_51, %c0_52] : memref<8x4x1xf32, #tpu.memory_space<vmem>>, vector<1x4x1xf32>
      %82 = vector.shape_cast %81 : vector<1x4x1xf32> to vector<4x1xf32>
      %83 = vector.shape_cast %80 : vector<4x1xf32> to vector<1x4x1xf32>
      tpu.vector_store %arg13[%c1_50, %c0_51, %c0_52], %83 {strides = array<i32>} : memref<8x4x1xf32, #tpu.memory_space<vmem>>, vector<1x4x1xf32>,
      %c2 = arith.constant 2 : index
      %c0_53 = arith.constant 0 : index
      %c0_54 = arith.constant 0 : index
      %84 = vector.load %arg13[%c2, %c0_53, %c0_54] : memref<8x4x1xf32, #tpu.memory_space<vmem>>, vector<1x4x1xf32>
      %85 = vector.shape_cast %84 : vector<1x4x1xf32> to vector<4x1xf32>
      %86 = arith.addf %85, %67 : vector<4x1xf32>
      %c2_55 = arith.constant 2 : index
      %c0_56 = arith.constant 0 : index
      %c0_57 = arith.constant 0 : index
      %87 = vector.load %arg13[%c2_55, %c0_56, %c0_57] : memref<8x4x1xf32, #tpu.memory_space<vmem>>, vector<1x4x1xf32>
      %88 = vector.shape_cast %87 : vector<1x4x1xf32> to vector<4x1xf32>
      %89 = vector.shape_cast %86 : vector<4x1xf32> to vector<1x4x1xf32>
      tpu.vector_store %arg13[%c2_55, %c0_56, %c0_57], %89 {strides = array<i32>} : memref<8x4x1xf32, #tpu.memory_space<vmem>>, vector<1x4x1xf32>,
      %c3 = arith.constant 3 : index
      %c0_58 = arith.constant 0 : index
      %c0_59 = arith.constant 0 : index
      %90 = vector.load %arg13[%c3, %c0_58, %c0_59] : memref<8x4x1xf32, #tpu.memory_space<vmem>>, vector<1x4x1xf32>
      %91 = vector.shape_cast %90 : vector<1x4x1xf32> to vector<4x1xf32>
      %92 = arith.addf %91, %71 : vector<4x1xf32>
      %c3_60 = arith.constant 3 : index
      %c0_61 = arith.constant 0 : index
      %c0_62 = arith.constant 0 : index
      %93 = vector.load %arg13[%c3_60, %c0_61, %c0_62] : memref<8x4x1xf32, #tpu.memory_space<vmem>>, vector<1x4x1xf32>
      %94 = vector.shape_cast %93 : vector<1x4x1xf32> to vector<4x1xf32>
      %95 = vector.shape_cast %92 : vector<4x1xf32> to vector<1x4x1xf32>
      tpu.vector_store %arg13[%c3_60, %c0_61, %c0_62], %95 {strides = array<i32>} : memref<8x4x1xf32, #tpu.memory_space<vmem>>, vector<1x4x1xf32>,
    } else {
    }
    %c1_i32 = arith.constant 1 : i32
    %10 = arith.cmpi eq, %arg0, %c1_i32 : i32
    %c0_i32_4 = arith.constant 0 : i32
    %11 = arith.cmpi eq, %arg1, %c0_i32_4 : i32
    %12 = arith.andi %10, %11 : i1
    %13 = arith.extui %12 : i1 to i32
    %c0_i32_5 = arith.constant 0 : i32
    %14 = arith.cmpi ne, %13, %c0_i32_5 : i32
    scf.if %14 {
      %c0 = arith.constant 0 : index
      %c0_12 = arith.constant 0 : index
      %26 = vector.load %arg6[%c0, %c0_12] : memref<4x1xf32, #tpu.memory_space<vmem>>, vector<4x1xf32>
      %c0_13 = arith.constant 0 : index
      %c0_14 = arith.constant 0 : index
      %27 = vector.load %arg7[%c0_13, %c0_14] : memref<4x1xf32, #tpu.memory_space<vmem>>, vector<4x1xf32>
      %c0_15 = arith.constant 0 : index
      %c0_16 = arith.constant 0 : index
      %c0_17 = arith.constant 0 : index
      %28 = vector.load %arg13[%c0_15, %c0_16, %c0_17] : memref<8x4x1xf32, #tpu.memory_space<vmem>>, vector<1x4x1xf32>
      %29 = vector.shape_cast %28 : vector<1x4x1xf32> to vector<4x1xf32>
      %cst = arith.constant 4.8828125E-4 : f32
      %30 = vector.broadcast %cst : f32 to vector<4x1xf32>
      %31 = arith.mulf %29, %30 : vector<4x1xf32>
      %c1 = arith.constant 1 : index
      %c0_18 = arith.constant 0 : index
      %c0_19 = arith.constant 0 : index
      %32 = vector.load %arg13[%c1, %c0_18, %c0_19] : memref<8x4x1xf32, #tpu.memory_space<vmem>>, vector<1x4x1xf32>
      %33 = vector.shape_cast %32 : vector<1x4x1xf32> to vector<4x1xf32>
      %cst_20 = arith.constant 4.8828125E-4 : f32
      %34 = vector.broadcast %cst_20 : f32 to vector<4x1xf32>
      %35 = arith.mulf %33, %34 : vector<4x1xf32>
      %36 = arith.mulf %31, %31 : vector<4x1xf32>
      %37 = arith.subf %35, %36 : vector<4x1xf32>
      %cst_21 = arith.constant 0.000000e+00 : f32
      %38 = vector.broadcast %cst_21 : f32 to vector<4x1xf32>
      %39 = arith.maximumf %37, %38 : vector<4x1xf32>
      %cst_22 = arith.constant 9.99999974E-6 : f32
      %40 = vector.broadcast %cst_22 : f32 to vector<4x1xf32>
      %41 = arith.addf %39, %40 : vector<4x1xf32>
      %42 = math.rsqrt %41 : vector<4x1xf32>
      %43 = arith.mulf %26, %42 : vector<4x1xf32>
      %c4 = arith.constant 4 : index
      %c0_23 = arith.constant 0 : index
      %c0_24 = arith.constant 0 : index
      %44 = vector.load %arg13[%c4, %c0_23, %c0_24] : memref<8x4x1xf32, #tpu.memory_space<vmem>>, vector<1x4x1xf32>
      %45 = vector.shape_cast %44 : vector<1x4x1xf32> to vector<4x1xf32>
      %46 = vector.shape_cast %43 : vector<4x1xf32> to vector<1x4x1xf32>
      tpu.vector_store %arg13[%c4, %c0_23, %c0_24], %46 {strides = array<i32>} : memref<8x4x1xf32, #tpu.memory_space<vmem>>, vector<1x4x1xf32>,
      %47 = arith.mulf %31, %43 : vector<4x1xf32>
      %48 = arith.subf %27, %47 : vector<4x1xf32>
      %c5 = arith.constant 5 : index
      %c0_25 = arith.constant 0 : index
      %c0_26 = arith.constant 0 : index
      %49 = vector.load %arg13[%c5, %c0_25, %c0_26] : memref<8x4x1xf32, #tpu.memory_space<vmem>>, vector<1x4x1xf32>
      %50 = vector.shape_cast %49 : vector<1x4x1xf32> to vector<4x1xf32>
      %51 = vector.shape_cast %48 : vector<4x1xf32> to vector<1x4x1xf32>
      tpu.vector_store %arg13[%c5, %c0_25, %c0_26], %51 {strides = array<i32>} : memref<8x4x1xf32, #tpu.memory_space<vmem>>, vector<1x4x1xf32>,
      %c0_27 = arith.constant 0 : index
      %c0_28 = arith.constant 0 : index
      %52 = vector.load %arg8[%c0_27, %c0_28] : memref<4x1xf32, #tpu.memory_space<vmem>>, vector<4x1xf32>
      %c0_29 = arith.constant 0 : index
      %c0_30 = arith.constant 0 : index
      %53 = vector.load %arg9[%c0_29, %c0_30] : memref<4x1xf32, #tpu.memory_space<vmem>>, vector<4x1xf32>
      %c2 = arith.constant 2 : index
      %c0_31 = arith.constant 0 : index
      %c0_32 = arith.constant 0 : index
      %54 = vector.load %arg13[%c2, %c0_31, %c0_32] : memref<8x4x1xf32, #tpu.memory_space<vmem>>, vector<1x4x1xf32>
      %55 = vector.shape_cast %54 : vector<1x4x1xf32> to vector<4x1xf32>
      %cst_33 = arith.constant 4.8828125E-4 : f32
      %56 = vector.broadcast %cst_33 : f32 to vector<4x1xf32>
      %57 = arith.mulf %55, %56 : vector<4x1xf32>
      %c3 = arith.constant 3 : index
      %c0_34 = arith.constant 0 : index
      %c0_35 = arith.constant 0 : index
      %58 = vector.load %arg13[%c3, %c0_34, %c0_35] : memref<8x4x1xf32, #tpu.memory_space<vmem>>, vector<1x4x1xf32>
      %59 = vector.shape_cast %58 : vector<1x4x1xf32> to vector<4x1xf32>
      %cst_36 = arith.constant 4.8828125E-4 : f32
      %60 = vector.broadcast %cst_36 : f32 to vector<4x1xf32>
      %61 = arith.mulf %59, %60 : vector<4x1xf32>
      %62 = arith.mulf %57, %57 : vector<4x1xf32>
      %63 = arith.subf %61, %62 : vector<4x1xf32>
      %cst_37 = arith.constant 0.000000e+00 : f32
      %64 = vector.broadcast %cst_37 : f32 to vector<4x1xf32>
      %65 = arith.maximumf %63, %64 : vector<4x1xf32>
      %cst_38 = arith.constant 9.99999974E-6 : f32
      %66 = vector.broadcast %cst_38 : f32 to vector<4x1xf32>
      %67 = arith.addf %65, %66 : vector<4x1xf32>
      %68 = math.rsqrt %67 : vector<4x1xf32>
      %69 = arith.mulf %52, %68 : vector<4x1xf32>
      %c6 = arith.constant 6 : index
      %c0_39 = arith.constant 0 : index
      %c0_40 = arith.constant 0 : index
      %70 = vector.load %arg13[%c6, %c0_39, %c0_40] : memref<8x4x1xf32, #tpu.memory_space<vmem>>, vector<1x4x1xf32>
      %71 = vector.shape_cast %70 : vector<1x4x1xf32> to vector<4x1xf32>
      %72 = vector.shape_cast %69 : vector<4x1xf32> to vector<1x4x1xf32>
      tpu.vector_store %arg13[%c6, %c0_39, %c0_40], %72 {strides = array<i32>} : memref<8x4x1xf32, #tpu.memory_space<vmem>>, vector<1x4x1xf32>,
      %73 = arith.mulf %57, %69 : vector<4x1xf32>
      %74 = arith.subf %53, %73 : vector<4x1xf32>
      %c7 = arith.constant 7 : index
      %c0_41 = arith.constant 0 : index
      %c0_42 = arith.constant 0 : index
      %75 = vector.load %arg13[%c7, %c0_41, %c0_42] : memref<8x4x1xf32, #tpu.memory_space<vmem>>, vector<1x4x1xf32>
      %76 = vector.shape_cast %75 : vector<1x4x1xf32> to vector<4x1xf32>
      %77 = vector.shape_cast %74 : vector<4x1xf32> to vector<1x4x1xf32>
      tpu.vector_store %arg13[%c7, %c0_41, %c0_42], %77 {strides = array<i32>} : memref<8x4x1xf32, #tpu.memory_space<vmem>>, vector<1x4x1xf32>,
    } else {
    }
    %c1_i32_6 = arith.constant 1 : i32
    %15 = arith.cmpi eq, %arg0, %c1_i32_6 : i32
    %16 = arith.extui %15 : i1 to i32
    %c0_i32_7 = arith.constant 0 : i32
    %17 = arith.cmpi ne, %16, %c0_i32_7 : i32
    scf.if %17 {
      %c0 = arith.constant 0 : index
      %c0_12 = arith.constant 0 : index
      %26 = vector.load %arg4[%c0, %c0_12] : memref<4x8xf32, #tpu.memory_space<vmem>>, vector<4x8xf32>
      %c0_13 = arith.constant 0 : index
      %c0_14 = arith.constant 0 : index
      %27 = vector.load %arg5[%c0_13, %c0_14] : memref<4x8xf32, #tpu.memory_space<vmem>>, vector<4x8xf32>
      %c0_15 = arith.constant 0 : index
      %c0_16 = arith.constant 0 : index
      %28 = vector.load %arg10[%c0_15, %c0_16] : memref<4x1xf32, #tpu.memory_space<vmem>>, vector<4x1xf32>
      %c4 = arith.constant 4 : index
      %c0_17 = arith.constant 0 : index
      %c0_18 = arith.constant 0 : index
      %29 = vector.load %arg13[%c4, %c0_17, %c0_18] : memref<8x4x1xf32, #tpu.memory_space<vmem>>, vector<1x4x1xf32>
      %30 = vector.shape_cast %29 : vector<1x4x1xf32> to vector<4x1xf32>
      %c5 = arith.constant 5 : index
      %c0_19 = arith.constant 0 : index
      %c0_20 = arith.constant 0 : index
      %31 = vector.load %arg13[%c5, %c0_19, %c0_20] : memref<8x4x1xf32, #tpu.memory_space<vmem>>, vector<1x4x1xf32>
      %32 = vector.shape_cast %31 : vector<1x4x1xf32> to vector<4x1xf32>
      %c6 = arith.constant 6 : index
      %c0_21 = arith.constant 0 : index
      %c0_22 = arith.constant 0 : index
      %33 = vector.load %arg13[%c6, %c0_21, %c0_22] : memref<8x4x1xf32, #tpu.memory_space<vmem>>, vector<1x4x1xf32>
      %34 = vector.shape_cast %33 : vector<1x4x1xf32> to vector<4x1xf32>
      %c7 = arith.constant 7 : index
      %c0_23 = arith.constant 0 : index
      %c0_24 = arith.constant 0 : index
      %35 = vector.load %arg13[%c7, %c0_23, %c0_24] : memref<8x4x1xf32, #tpu.memory_space<vmem>>, vector<1x4x1xf32>
      %36 = vector.shape_cast %35 : vector<1x4x1xf32> to vector<4x1xf32>
      %cst = arith.constant 0.000000e+00 : f32
      %37 = vector.broadcast %cst : f32 to vector<1x1xf32>
      %cst_25 = arith.constant 0.000000e+00 : f32
      %38 = vector.broadcast %cst_25 : f32 to vector<1x1xf32>
      %c0_26 = arith.constant 0 : index
      %c0_27 = arith.constant 0 : index
      %c0_28 = arith.constant 0 : index
      %39 = vector.load %arg2[%c0_26, %c0_27, %c0_28] : memref<2x8x512xf32, #tpu.memory_space<vmem>>, vector<1x8x512xf32>
      %40 = vector.shape_cast %39 : vector<1x8x512xf32> to vector<8x512xf32>
      %cst_29 = arith.constant dense<0.000000e+00> : vector<4x512xf32>
      %41 = tpu.matmul %26, %40, %cst_29 {dimension_numbers = #tpu.dot_dimension_numbers<[1], [0], [0], [1], [0, 0, 1, 1], [], []>} : vector<4x8xf32>, vector<8x512xf32>, vector<4x512xf32> -> vector<4x512xf32>
      %c0_30 = arith.constant 0 : index
      %c0_31 = arith.constant 0 : index
      %c0_32 = arith.constant 0 : index
      %42 = vector.load %arg3[%c0_30, %c0_31, %c0_32] : memref<2x8x512xf32, #tpu.memory_space<vmem>>, vector<1x8x512xf32>
      %43 = vector.shape_cast %42 : vector<1x8x512xf32> to vector<8x512xf32>
      %cst_33 = arith.constant dense<0.000000e+00> : vector<4x512xf32>
      %44 = tpu.matmul %27, %43, %cst_33 {dimension_numbers = #tpu.dot_dimension_numbers<[1], [0], [0], [1], [0, 0, 1, 1], [], []>} : vector<4x8xf32>, vector<8x512xf32>, vector<4x512xf32> -> vector<4x512xf32>
      %45 = vector.broadcast %30 : vector<4x1xf32> to vector<4x512xf32>
      %46 = arith.mulf %41, %45 : vector<4x512xf32>
      %47 = vector.broadcast %32 : vector<4x1xf32> to vector<4x512xf32>
      %48 = arith.addf %46, %47 : vector<4x512xf32>
      %49 = vector.broadcast %34 : vector<4x1xf32> to vector<4x512xf32>
      %50 = arith.mulf %44, %49 : vector<4x512xf32>
      %51 = arith.addf %48, %50 : vector<4x512xf32>
      %52 = vector.broadcast %36 : vector<4x1xf32> to vector<4x512xf32>
      %53 = arith.addf %51, %52 : vector<4x512xf32>
      %cst_34 = arith.constant 0.000000e+00 : f32
      %54 = vector.broadcast %cst_34 : f32 to vector<4x512xf32>
      %55 = arith.maximumf %53, %54 : vector<4x512xf32>
      %56 = vector.broadcast %28 : vector<4x1xf32> to vector<4x512xf32>
      %57 = arith.mulf %55, %56 : vector<4x512xf32>
      %cst_35 = arith.constant dense<0.000000e+00> : vector<512xf32>
      %58 = vector.multi_reduction <add>, %57, %cst_35 [0] : vector<4x512xf32> to vector<512xf32>
      %59 = vector.shape_cast %58 : vector<512xf32> to vector<1x512xf32>
      %c0_36 = arith.constant 0 : index
      %60 = arith.index_cast %1 : i32 to index
      %61 = vector.load %arg15[%c0_36, %60] : memref<2x1024xf32, #tpu.memory_space<vmem>>, vector<1x512xf32>
      tpu.vector_store %arg15[%c0_36, %60], %59 {strides = array<i32>} : memref<2x1024xf32, #tpu.memory_space<vmem>>, vector<1x512xf32>,
      %cst_37 = arith.constant dense<0.000000e+00> : vector<1xf32>
      %62 = vector.multi_reduction <add>, %59, %cst_37 [1] : vector<1x512xf32> to vector<1xf32>
      %63 = vector.shape_cast %62 : vector<1xf32> to vector<1x1xf32>
      %64 = arith.addf %37, %63 : vector<1x1xf32>
      %65 = arith.mulf %59, %59 : vector<1x512xf32>
      %cst_38 = arith.constant dense<0.000000e+00> : vector<1xf32>
      %66 = vector.multi_reduction <add>, %65, %cst_38 [1] : vector<1x512xf32> to vector<1xf32>
      %67 = vector.shape_cast %66 : vector<1xf32> to vector<1x1xf32>
      %68 = arith.addf %38, %67 : vector<1x1xf32>
      %c1 = arith.constant 1 : index
      %c0_39 = arith.constant 0 : index
      %c0_40 = arith.constant 0 : index
      %69 = vector.load %arg2[%c1, %c0_39, %c0_40] : memref<2x8x512xf32, #tpu.memory_space<vmem>>, vector<1x8x512xf32>
      %70 = vector.shape_cast %69 : vector<1x8x512xf32> to vector<8x512xf32>
      %cst_41 = arith.constant dense<0.000000e+00> : vector<4x512xf32>
      %71 = tpu.matmul %26, %70, %cst_41 {dimension_numbers = #tpu.dot_dimension_numbers<[1], [0], [0], [1], [0, 0, 1, 1], [], []>} : vector<4x8xf32>, vector<8x512xf32>, vector<4x512xf32> -> vector<4x512xf32>
      %c1_42 = arith.constant 1 : index
      %c0_43 = arith.constant 0 : index
      %c0_44 = arith.constant 0 : index
      %72 = vector.load %arg3[%c1_42, %c0_43, %c0_44] : memref<2x8x512xf32, #tpu.memory_space<vmem>>, vector<1x8x512xf32>
      %73 = vector.shape_cast %72 : vector<1x8x512xf32> to vector<8x512xf32>
      %cst_45 = arith.constant dense<0.000000e+00> : vector<4x512xf32>
      %74 = tpu.matmul %27, %73, %cst_45 {dimension_numbers = #tpu.dot_dimension_numbers<[1], [0], [0], [1], [0, 0, 1, 1], [], []>} : vector<4x8xf32>, vector<8x512xf32>, vector<4x512xf32> -> vector<4x512xf32>
      %75 = vector.broadcast %30 : vector<4x1xf32> to vector<4x512xf32>
      %76 = arith.mulf %71, %75 : vector<4x512xf32>
      %77 = vector.broadcast %32 : vector<4x1xf32> to vector<4x512xf32>
      %78 = arith.addf %76, %77 : vector<4x512xf32>
      %79 = vector.broadcast %34 : vector<4x1xf32> to vector<4x512xf32>
      %80 = arith.mulf %74, %79 : vector<4x512xf32>
      %81 = arith.addf %78, %80 : vector<4x512xf32>
      %82 = vector.broadcast %36 : vector<4x1xf32> to vector<4x512xf32>
      %83 = arith.addf %81, %82 : vector<4x512xf32>
      %cst_46 = arith.constant 0.000000e+00 : f32
      %84 = vector.broadcast %cst_46 : f32 to vector<4x512xf32>
      %85 = arith.maximumf %83, %84 : vector<4x512xf32>
      %86 = vector.broadcast %28 : vector<4x1xf32> to vector<4x512xf32>
      %87 = arith.mulf %85, %86 : vector<4x512xf32>
      %cst_47 = arith.constant dense<0.000000e+00> : vector<512xf32>
      %88 = vector.multi_reduction <add>, %87, %cst_47 [0] : vector<4x512xf32> to vector<512xf32>
      %89 = vector.shape_cast %88 : vector<512xf32> to vector<1x512xf32>
      %c1_48 = arith.constant 1 : index
      %90 = arith.index_cast %1 : i32 to index
      %91 = vector.load %arg15[%c1_48, %90] : memref<2x1024xf32, #tpu.memory_space<vmem>>, vector<1x512xf32>
      tpu.vector_store %arg15[%c1_48, %90], %89 {strides = array<i32>} : memref<2x1024xf32, #tpu.memory_space<vmem>>, vector<1x512xf32>,
      %cst_49 = arith.constant dense<0.000000e+00> : vector<1xf32>
      %92 = vector.multi_reduction <add>, %89, %cst_49 [1] : vector<1x512xf32> to vector<1xf32>
      %93 = vector.shape_cast %92 : vector<1xf32> to vector<1x1xf32>
      %94 = arith.addf %64, %93 : vector<1x1xf32>
      %95 = arith.mulf %89, %89 : vector<1x512xf32>
      %cst_50 = arith.constant dense<0.000000e+00> : vector<1xf32>
      %96 = vector.multi_reduction <add>, %95, %cst_50 [1] : vector<1x512xf32> to vector<1xf32>
      %97 = vector.shape_cast %96 : vector<1xf32> to vector<1x1xf32>
      %98 = arith.addf %68, %97 : vector<1x1xf32>
      %c0_51 = arith.constant 0 : index
      %c0_52 = arith.constant 0 : index
      %c0_53 = arith.constant 0 : index
      %99 = vector.load %arg14[%c0_51, %c0_52, %c0_53] : memref<4x1x1xf32, #tpu.memory_space<vmem>>, vector<1x1x1xf32>
      %100 = vector.shape_cast %99 : vector<1x1x1xf32> to vector<1x1xf32>
      %101 = arith.addf %100, %94 : vector<1x1xf32>
      %c0_54 = arith.constant 0 : index
      %c0_55 = arith.constant 0 : index
      %c0_56 = arith.constant 0 : index
      %102 = vector.load %arg14[%c0_54, %c0_55, %c0_56] : memref<4x1x1xf32, #tpu.memory_space<vmem>>, vector<1x1x1xf32>
      %103 = vector.shape_cast %102 : vector<1x1x1xf32> to vector<1x1xf32>
      %104 = vector.shape_cast %101 : vector<1x1xf32> to vector<1x1x1xf32>
      tpu.vector_store %arg14[%c0_54, %c0_55, %c0_56], %104 {strides = array<i32>} : memref<4x1x1xf32, #tpu.memory_space<vmem>>, vector<1x1x1xf32>,
      %c1_57 = arith.constant 1 : index
      %c0_58 = arith.constant 0 : index
      %c0_59 = arith.constant 0 : index
      %105 = vector.load %arg14[%c1_57, %c0_58, %c0_59] : memref<4x1x1xf32, #tpu.memory_space<vmem>>, vector<1x1x1xf32>
      %106 = vector.shape_cast %105 : vector<1x1x1xf32> to vector<1x1xf32>
      %107 = arith.addf %106, %98 : vector<1x1xf32>
      %c1_60 = arith.constant 1 : index
      %c0_61 = arith.constant 0 : index
      %c0_62 = arith.constant 0 : index
      %108 = vector.load %arg14[%c1_60, %c0_61, %c0_62] : memref<4x1x1xf32, #tpu.memory_space<vmem>>, vector<1x1x1xf32>
      %109 = vector.shape_cast %108 : vector<1x1x1xf32> to vector<1x1xf32>
      %110 = vector.shape_cast %107 : vector<1x1xf32> to vector<1x1x1xf32>
      tpu.vector_store %arg14[%c1_60, %c0_61, %c0_62], %110 {strides = array<i32>} : memref<4x1x1xf32, #tpu.memory_space<vmem>>, vector<1x1x1xf32>,
    } else {
    }
    %c2_i32 = arith.constant 2 : i32
    %18 = arith.cmpi eq, %arg0, %c2_i32 : i32
    %c0_i32_8 = arith.constant 0 : i32
    %19 = arith.cmpi eq, %arg1, %c0_i32_8 : i32
    %20 = arith.andi %18, %19 : i1
    %21 = arith.extui %20 : i1 to i32
    %c0_i32_9 = arith.constant 0 : i32
    %22 = arith.cmpi ne, %21, %c0_i32_9 : i32
    scf.if %22 {
      %c0 = arith.constant 0 : index
      %c0_12 = arith.constant 0 : index
      %c0_13 = arith.constant 0 : index
      %26 = vector.load %arg14[%c0, %c0_12, %c0_13] : memref<4x1x1xf32, #tpu.memory_space<vmem>>, vector<1x1x1xf32>
      %27 = vector.shape_cast %26 : vector<1x1x1xf32> to vector<1x1xf32>
      %cst = arith.constant 4.8828125E-4 : f32
      %28 = vector.broadcast %cst : f32 to vector<1x1xf32>
      %29 = arith.mulf %27, %28 : vector<1x1xf32>
      %c1 = arith.constant 1 : index
      %c0_14 = arith.constant 0 : index
      %c0_15 = arith.constant 0 : index
      %30 = vector.load %arg14[%c1, %c0_14, %c0_15] : memref<4x1x1xf32, #tpu.memory_space<vmem>>, vector<1x1x1xf32>
      %31 = vector.shape_cast %30 : vector<1x1x1xf32> to vector<1x1xf32>
      %cst_16 = arith.constant 4.8828125E-4 : f32
      %32 = vector.broadcast %cst_16 : f32 to vector<1x1xf32>
      %33 = arith.mulf %31, %32 : vector<1x1xf32>
      %34 = arith.mulf %29, %29 : vector<1x1xf32>
      %35 = arith.subf %33, %34 : vector<1x1xf32>
      %cst_17 = arith.constant 0.000000e+00 : f32
      %36 = vector.broadcast %cst_17 : f32 to vector<1x1xf32>
      %37 = arith.maximumf %35, %36 : vector<1x1xf32>
      %c0_18 = arith.constant 0 : index
      %38 = memref.load %arg11[%c0_18] : memref<2xf32, #tpu.memory_space<smem>>
      %cst_19 = arith.constant 9.99999974E-6 : f32
      %39 = vector.broadcast %cst_19 : f32 to vector<1x1xf32>
      %40 = arith.addf %37, %39 : vector<1x1xf32>
      %41 = math.rsqrt %40 : vector<1x1xf32>
      %42 = vector.broadcast %38 : f32 to vector<1x1xf32>
      %43 = arith.mulf %42, %41 : vector<1x1xf32>
      %c2 = arith.constant 2 : index
      %c0_20 = arith.constant 0 : index
      %c0_21 = arith.constant 0 : index
      %44 = vector.load %arg14[%c2, %c0_20, %c0_21] : memref<4x1x1xf32, #tpu.memory_space<vmem>>, vector<1x1x1xf32>
      %45 = vector.shape_cast %44 : vector<1x1x1xf32> to vector<1x1xf32>
      %46 = vector.shape_cast %43 : vector<1x1xf32> to vector<1x1x1xf32>
      tpu.vector_store %arg14[%c2, %c0_20, %c0_21], %46 {strides = array<i32>} : memref<4x1x1xf32, #tpu.memory_space<vmem>>, vector<1x1x1xf32>,
      %c1_22 = arith.constant 1 : index
      %47 = memref.load %arg11[%c1_22] : memref<2xf32, #tpu.memory_space<smem>>
      %48 = arith.mulf %29, %43 : vector<1x1xf32>
      %49 = vector.broadcast %47 : f32 to vector<1x1xf32>
      %50 = arith.subf %49, %48 : vector<1x1xf32>
      %c3 = arith.constant 3 : index
      %c0_23 = arith.constant 0 : index
      %c0_24 = arith.constant 0 : index
      %51 = vector.load %arg14[%c3, %c0_23, %c0_24] : memref<4x1x1xf32, #tpu.memory_space<vmem>>, vector<1x1x1xf32>
      %52 = vector.shape_cast %51 : vector<1x1x1xf32> to vector<1x1xf32>
      %53 = vector.shape_cast %50 : vector<1x1xf32> to vector<1x1x1xf32>
      tpu.vector_store %arg14[%c3, %c0_23, %c0_24], %53 {strides = array<i32>} : memref<4x1x1xf32, #tpu.memory_space<vmem>>, vector<1x1x1xf32>,
    } else {
    }
    %c2_i32_10 = arith.constant 2 : i32
    %23 = arith.cmpi eq, %arg0, %c2_i32_10 : i32
    %24 = arith.extui %23 : i1 to i32
    %c0_i32_11 = arith.constant 0 : i32
    %25 = arith.cmpi ne, %24, %c0_i32_11 : i32
    scf.if %25 {
      %c2 = arith.constant 2 : index
      %c0 = arith.constant 0 : index
      %c0_12 = arith.constant 0 : index
      %26 = vector.load %arg14[%c2, %c0, %c0_12] : memref<4x1x1xf32, #tpu.memory_space<vmem>>, vector<1x1x1xf32>
      %27 = vector.shape_cast %26 : vector<1x1x1xf32> to vector<1x1xf32>
      %c3 = arith.constant 3 : index
      %c0_13 = arith.constant 0 : index
      %c0_14 = arith.constant 0 : index
      %28 = vector.load %arg14[%c3, %c0_13, %c0_14] : memref<4x1x1xf32, #tpu.memory_space<vmem>>, vector<1x1x1xf32>
      %29 = vector.shape_cast %28 : vector<1x1x1xf32> to vector<1x1xf32>
      %c0_15 = arith.constant 0 : index
      %30 = arith.index_cast %1 : i32 to index
      %31 = vector.load %arg15[%c0_15, %30] : memref<2x1024xf32, #tpu.memory_space<vmem>>, vector<1x512xf32>
      %32 = vector.broadcast %27 : vector<1x1xf32> to vector<1x512xf32>
      %33 = arith.mulf %31, %32 : vector<1x512xf32>
      %34 = vector.broadcast %29 : vector<1x1xf32> to vector<1x512xf32>
      %35 = arith.addf %33, %34 : vector<1x512xf32>
      %cst = arith.constant 5.000000e-01 : f32
      %36 = vector.broadcast %cst : f32 to vector<1x512xf32>
      %37 = arith.mulf %36, %35 : vector<1x512xf32>
      %38 = math.tanh %37 : vector<1x512xf32>
      %cst_16 = arith.constant 1.000000e+00 : f32
      %39 = vector.broadcast %cst_16 : f32 to vector<1x512xf32>
      %40 = arith.addf %38, %39 : vector<1x512xf32>
      %cst_17 = arith.constant 5.000000e-01 : f32
      %41 = vector.broadcast %cst_17 : f32 to vector<1x512xf32>
      %42 = arith.mulf %41, %40 : vector<1x512xf32>
      %c0_18 = arith.constant 0 : index
      %c0_19 = arith.constant 0 : index
      %c0_20 = arith.constant 0 : index
      %43 = vector.load %arg3[%c0_18, %c0_19, %c0_20] : memref<2x8x512xf32, #tpu.memory_space<vmem>>, vector<1x8x512xf32>
      %44 = vector.shape_cast %43 : vector<1x8x512xf32> to vector<8x512xf32>
      %45 = vector.broadcast %42 : vector<1x512xf32> to vector<8x512xf32>
      %46 = arith.mulf %44, %45 : vector<8x512xf32>
      %c0_21 = arith.constant 0 : index
      %c0_22 = arith.constant 0 : index
      %c0_23 = arith.constant 0 : index
      %47 = vector.load %arg12[%c0_21, %c0_22, %c0_23] : memref<2x8x512xf32, #tpu.memory_space<vmem>>, vector<1x8x512xf32>
      %48 = vector.shape_cast %47 : vector<1x8x512xf32> to vector<8x512xf32>
      %49 = vector.shape_cast %46 : vector<8x512xf32> to vector<1x8x512xf32>
      tpu.vector_store %arg12[%c0_21, %c0_22, %c0_23], %49 {strides = array<i32>} : memref<2x8x512xf32, #tpu.memory_space<vmem>>, vector<1x8x512xf32>,
      %c1 = arith.constant 1 : index
      %50 = arith.index_cast %1 : i32 to index
      %51 = vector.load %arg15[%c1, %50] : memref<2x1024xf32, #tpu.memory_space<vmem>>, vector<1x512xf32>
      %52 = vector.broadcast %27 : vector<1x1xf32> to vector<1x512xf32>
      %53 = arith.mulf %51, %52 : vector<1x512xf32>
      %54 = vector.broadcast %29 : vector<1x1xf32> to vector<1x512xf32>
      %55 = arith.addf %53, %54 : vector<1x512xf32>
      %cst_24 = arith.constant 5.000000e-01 : f32
      %56 = vector.broadcast %cst_24 : f32 to vector<1x512xf32>
      %57 = arith.mulf %56, %55 : vector<1x512xf32>
      %58 = math.tanh %57 : vector<1x512xf32>
      %cst_25 = arith.constant 1.000000e+00 : f32
      %59 = vector.broadcast %cst_25 : f32 to vector<1x512xf32>
      %60 = arith.addf %58, %59 : vector<1x512xf32>
      %cst_26 = arith.constant 5.000000e-01 : f32
      %61 = vector.broadcast %cst_26 : f32 to vector<1x512xf32>
      %62 = arith.mulf %61, %60 : vector<1x512xf32>
      %c1_27 = arith.constant 1 : index
      %c0_28 = arith.constant 0 : index
      %c0_29 = arith.constant 0 : index
      %63 = vector.load %arg3[%c1_27, %c0_28, %c0_29] : memref<2x8x512xf32, #tpu.memory_space<vmem>>, vector<1x8x512xf32>
      %64 = vector.shape_cast %63 : vector<1x8x512xf32> to vector<8x512xf32>
      %65 = vector.broadcast %62 : vector<1x512xf32> to vector<8x512xf32>
      %66 = arith.mulf %64, %65 : vector<8x512xf32>
      %c1_30 = arith.constant 1 : index
      %c0_31 = arith.constant 0 : index
      %c0_32 = arith.constant 0 : index
      %67 = vector.load %arg12[%c1_30, %c0_31, %c0_32] : memref<2x8x512xf32, #tpu.memory_space<vmem>>, vector<1x8x512xf32>
      %68 = vector.shape_cast %67 : vector<1x8x512xf32> to vector<8x512xf32>
      %69 = vector.shape_cast %66 : vector<8x512xf32> to vector<1x8x512xf32>
      tpu.vector_store %arg12[%c1_30, %c0_31, %c0_32], %69 {strides = array<i32>} : memref<2x8x512xf32, #tpu.memory_space<vmem>>, vector<1x8x512xf32>,
    } else {
    }
    return
  }
  func.func @transform_0(%arg0: i32, %arg1: i32) -> (i32, i32, i32) {
    %c2_i32 = arith.constant 2 : i32
    %0 = arith.cmpi eq, %arg0, %c2_i32 : i32
    %c1_i32 = arith.constant 1 : i32
    %1 = arith.select %0, %c1_i32, %arg1 : i32
    %c0_i32 = arith.constant 0 : i32
    %c0_i32_0 = arith.constant 0 : i32
    %c0_i32_1 = arith.constant 0 : i32
    return %c0_i32, %c0_i32_0, %1 : i32, i32, i32
  }
  func.func @transform_1(%arg0: i32, %arg1: i32) -> (i32, i32, i32) {
    %c0_i32 = arith.constant 0 : i32
    %c0_i32_0 = arith.constant 0 : i32
    %c0_i32_1 = arith.constant 0 : i32
    return %c0_i32, %c0_i32_0, %arg1 : i32, i32, i32
  }
  func.func @transform_2(%arg0: i32, %arg1: i32) -> (i32, i32) {
    %c0_i32 = arith.constant 0 : i32
    %c0_i32_0 = arith.constant 0 : i32
    %c0_i32_1 = arith.constant 0 : i32
    return %c0_i32, %c0_i32_0 : i32, i32
  }
  func.func @transform_3(%arg0: i32, %arg1: i32) -> (i32, i32) {
    %c0_i32 = arith.constant 0 : i32
    %c0_i32_0 = arith.constant 0 : i32
    %c0_i32_1 = arith.constant 0 : i32
    return %c0_i32, %c0_i32_0 : i32, i32
  }
  func.func @transform_4(%arg0: i32, %arg1: i32) -> (i32, i32) {
    %c0_i32 = arith.constant 0 : i32
    %c0_i32_0 = arith.constant 0 : i32
    %c0_i32_1 = arith.constant 0 : i32
    return %c0_i32, %c0_i32_0 : i32, i32
  }
  func.func @transform_5(%arg0: i32, %arg1: i32) -> (i32, i32) {
    %c0_i32 = arith.constant 0 : i32
    %c0_i32_0 = arith.constant 0 : i32
    %c0_i32_1 = arith.constant 0 : i32
    return %c0_i32, %c0_i32_0 : i32, i32
  }
  func.func @transform_6(%arg0: i32, %arg1: i32) -> (i32, i32) {
    %c0_i32 = arith.constant 0 : i32
    %c0_i32_0 = arith.constant 0 : i32
    %c0_i32_1 = arith.constant 0 : i32
    return %c0_i32, %c0_i32_0 : i32, i32
  }
  func.func @transform_7(%arg0: i32, %arg1: i32) -> (i32, i32) {
    %c0_i32 = arith.constant 0 : i32
    %c0_i32_0 = arith.constant 0 : i32
    %c0_i32_1 = arith.constant 0 : i32
    return %c0_i32, %c0_i32_0 : i32, i32
  }
  func.func @transform_8(%arg0: i32, %arg1: i32) -> (i32, i32) {
    %c0_i32 = arith.constant 0 : i32
    %c0_i32_0 = arith.constant 0 : i32
    %c0_i32_1 = arith.constant 0 : i32
    return %c0_i32, %c0_i32_0 : i32, i32
  }
  func.func @transform_9(%arg0: i32, %arg1: i32) -> i32 {
    %c0_i32 = arith.constant 0 : i32
    %c0_i32_0 = arith.constant 0 : i32
    return %c0_i32 : i32
  }
  func.func @transform_10(%arg0: i32, %arg1: i32) -> (i32, i32, i32) {
    %c2_i32 = arith.constant 2 : i32
    %0 = arith.cmpi eq, %arg0, %c2_i32 : i32
    %c0_i32 = arith.constant 0 : i32
    %1 = arith.select %0, %arg1, %c0_i32 : i32
    %c0_i32_0 = arith.constant 0 : i32
    %c0_i32_1 = arith.constant 0 : i32
    %c0_i32_2 = arith.constant 0 : i32
    return %c0_i32_0, %c0_i32_1, %1 : i32, i32, i32
  }
}

</mosaic_0001>

<bundles_post_ra>
// kernel: attention_forward.1
= control target key start
LH: loop header
LB: loop body
LE: loop exit
PB: predicated region body
PF: predicated region fallthrough
CT: control target
= control target key end

     0   :  { %s3149_s0 = inlined_call_operand.vmem [shape: f32[2,8,1024], index: 0, kind: input, shape index: {}]   ;;  %s3150_s1 = inlined_call_operand.vmem [shape: f32[2,8,1024], index: 1, kind: input, shape index: {}]   ;;  %s3151_s2 = inlined_call_operand.vmem [shape: f32[4,8], index: 2, kind: input, shape index: {}]   ;;  %s3152_s3 = inlined_call_operand.vmem [shape: f32[4,8], index: 3, kind: input, shape index: {}]   ;;  %s3153_s4 = inlined_call_operand.vmem [shape: f32[4,1], index: 4, kind: input, shape index: {}]   ;;  %s3154_s5 = inlined_call_operand.vmem [shape: f32[4,1], index: 5, kind: input, shape index: {}]   ;;  %s3155_s6 = inlined_call_operand.vmem [shape: f32[4,1], index: 6, kind: input, shape index: {}]   ;;  %s3156_s7 = inlined_call_operand.vmem [shape: f32[4,1], index: 7, kind: input, shape index: {}]   ;;  %s3157_s8 = inlined_call_operand.vmem [shape: f32[4,1], index: 8, kind: input, shape index: {}]   ;;  %s3158_s9 = inlined_call_operand.vmem [shape: f32[2], index: 9, kind: input, shape index: {}]   ;;  %s3159_s10 = inlined_call_operand.vmem [shape: f32[2,8,1024], index: 10, kind: output, shape index: {}]  }
   0x1   :  { %3164 = sst [smem:[#allocation17_spill]] %s3154_s5 }
   0x2   :  { %3165 = sst [smem:[#allocation18_spill]] %s3156_s7 }
   0x3   :  { %3166 = sst [smem:[#allocation19_spill]] %s3157_s8 }
   0x4   :  { %3167 = sst [smem:[#allocation20_spill]] %s3158_s9 }
   0x5   :  { %3168 = sst [smem:[#allocation21_spill]] %s3159_s10 }
   0x6   :  { %15 = vsyncpa [#allocation8], 0  ;;  %s2760_s13 = smov 0   ;;  %s2762_s14 = smov 0  }
   0x7   :  { %s2764_s15 = smov 0   ;;  %s2766_s16 = smov 0  }
   0x8   :  { %s2768_s17 = smov 0   ;;  %s2770_s18 = smov 0  }
   0x9   :  { %s2772_s19 = smov 0   ;;  %s2774_s20 = smov 0  }
   0xa   :  { %s2776_s21 = smov 0   ;;  %s2778_s22 = smov 0  }
   0xb   :  { %s2780_s23 = smov 0  }
   0xc LB: > { %3169 = sst [smem:[#allocation11_spill]] %s2692_s22  ;;  %s30_s25 = sadd.s32 1, %s2688_s21  ;;  %s2696_s23 = sphi %s2780_s23, %s21_s23   ;;  %s2692_s22 = sphi %s2778_s22, %s3196_s22   ;;  %s2688_s21 = sphi %s2776_s21, %s3204_s21   ;;  %s2684_s20 = sphi %s2774_s20, %s3194_s20   ;;  %s2680_s19 = sphi %s2772_s19, %s3203_s19   ;;  %s2676_s18 = sphi %s2770_s18, %s3202_s18   ;;  %s2672_s17 = sphi %s2768_s17, %s3201_s17   ;;  %s2668_s16 = sphi %s2766_s16, %s3200_s16   ;;  %s2664_s15 = sphi %s2764_s15, %s3199_s15   ;;  %s2660_s14 = sphi %s2762_s14, %s3198_s14   ;;  %s2656_s13 = sphi %s2760_s13, %s3197_s13  }
   0xd   : > { %p31_p0 = scmp.ge.s32.totalorder %s30_s25, 2  ;;  %s33_s26 = sadd.s32 1, %s2692_s22 }
   0xe   : > { %p37_p1 = scmp.eq.s32.totalorder %s2692_s22, 2  ;;  %s44_s27 = sadd.s32 1, %s2676_s18 }
   0xf   : > { %s3206_s25 = smov (%p31_p0, %s30_s25), 0  ;;  %s3208_s26 = smov (!%p31_p0, %s33_s26), %s2692_s22 }
  0x10   : > { %3170 = sst [smem:[#allocation12_spill]] %s3206_s25  ;;  %p35_p2 = scmp.ge.s32.totalorder %s3208_s26, 3 }
  0x11   : > { %s2826_s28 = scalar_select %p37_p1, 1, %s2688_s21 }
  0x12   : > { %p51_p3 = scmp.ne.s32.totalorder %s2676_s18, %s2672_s17  ;;  %p52_p4 = scmp.eq.s32.totalorder %s2696_s23, 0 }
  0x13   : > { %s67_s29 = ssub.s32 %s2688_s21, %s3206_s25  ;;  %s3210_s26 = smov (%p35_p2, %s3208_s26), 0 }
  0x14   : > { %3171 = sst [smem:[#allocation13_spill]] %s3210_s26  ;;  %p2837_p5 = por %p52_p4, %p51_p3 }
  0x15   : > { %p68_p6 = scmp.eq.s32.totalorder %s67_s29, 0  ;;  %p39_p7 = scmp.eq.s32.totalorder %s3210_s26, 2 }
  0x16   : > { %s70_s11 = sadd.s32 1, %s2668_s16  ;;  %p77_p8 = scmp.ne.s32.totalorder %s2668_s16, %s2664_s15 }
  0x17   : > { %s2844_s12 = scalar_select %p68_p6, %s2668_s16, %s70_s11  }
  0x18   : > { %s40_s24 = scalar_select %p39_p7, 1, %s3206_s25 }
  0x19   : > { %3173 = sst [smem:[#allocation14_spill]] %s2844_s12  ;;  %s268_s10 = sadd.s32 1, %s2660_s14 }
  0x1a   : > { %s41_s8 = ssub.s32 %s2826_s28, %s40_s24  ;;  %p278_p9 = scmp.ne.s32.totalorder %s2660_s14, %s2656_s13 }
  0x1b   : > { %p42_p10 = scmp.eq.s32.totalorder %s41_s8, 0  ;;  %p2855_p11 = por %p77_p8, %p52_p4 }
  0x1c   : > { %s262_s29 = scalar_select %p37_p1, %s2688_s21, 0 }
  0x1d   : > { %s2863_s26 = scalar_select %p42_p10, %s2676_s18, %s44_s27  }
  0x1e   : > { %s264_s5 = scalar_select %p39_p7, %s3206_s25, 0 }
  0x1f   : > { %3175 = sst [smem:[#allocation15_spill]] %s2863_s26  ;;  %s3176_s11 = sadd.s32 4294967295, %s2696_s23  }
  0x20   : > { %p279_p12 = scmp.eq.s32.totalorder %s3176_s11, 5  ;;  %p2402_p13 = scmp.ge.s32.totalorder %s2696_s23, 1 }
  0x21   : > { %s265_s12 = ssub.s32 %s262_s29, %s264_s5  ;;  %p292_p0 = scmp.lt.s32.totalorder %s2696_s23, 7 }
  0x22   : > { %p266_p2 = scmp.eq.s32.totalorder %s265_s12, 0  ;;  %p2870_p3 = por %p279_p12, %p278_p9 }
  0x23   : > { %p2874_p6 = pnand %p2402_p13, %p292_p0  ;;  %s3180_s27 = smov %s3176_s11 }
  0x24   : > { %s3177_s24 = scalar_select %p2870_p3, 1, 0 }
  0x25   : > { %s3178_s8 = scalar_select %p2874_p6, 1, 0 }
  0x26   : > { %s2879_s22 = scalar_select %p266_p2, %s2660_s14, %s268_s10  }
  0x27   : > { %p2477_p1 = pneg %p2874_p6  ;;  %p2885_p4 = scmp.eq.s32.totalorder %s3180_s27, 0 }
  0x28   : > { %3179 = sst [smem:[#allocation16_spill]] %s2879_s22 }
  0x29   : > { %s3182_s9 = sld [smem:[#allocation20_spill]]  ;;  %p2478_p7 = pnand %p2885_p4, %p2477_p1 }
  0x2b   : > { %p2593_p9 = pneg %p2478_p7 }
  0x2f   : > { %s326_s29 = sshll.u32 %s3182_s9, 4  ;;  %s327_s29 = int_to_ptr.vmem [resolvable:$true] %s326_s29 }
  0x30   : > { %s2591_s25 = scalar_lea.vmem %s327_s29, 16  ;;  %p2599_p13 = scmp.lt.s32.totalorder %s327_s29, %s327_s29 }
  0x31   : > { %p2592_p8 = scmp.ne.s32.totalorder %s327_s29, %s2591_s25  ;;  %p2600_p0 = scmp.lt.s32.totalorder %s2591_s25, %s2591_s25 }
  0x33   : > { %p2594_p10 = pnand %p2593_p9, %p2592_p8  ;;  %p2601_p2 = por %p2600_p0, %p2599_p13 }
  0x35   : > { %p2595_p12 = pneg %p2594_p10 }
  0x37   : > { %p2602_p3 = pnand %p2601_p2, %p2595_p12 }
  0x39   : > { %2605 = shalt.err (!%p2602_p3)
}
  0x3a   : > { %s2698_s10 = smov [#allocation7]   ;;  %p2404_p6 = scmp.ge.s32.totalorder %s2696_s23, 6 }
  0x3b   : > { %2480 = dma.vmem_to_smem (!%p2478_p7), %s327_s29, 16, %s2698_s10, [#allocation8]  }
  0x3c   : > { %333 = sbr.rel (%p2404_p6) target bundleno = 81 (0x51), region = 48 }
  0x41   : > { %336 = sbr.rel (!%p2837_p5) target bundleno = 73 (0x49), region = 52  ;;  %s338_s27 = sand.u32 (%p2837_p5), 1, %s2676_s18  }
  0x42   : > { %s2470_s5 = sshll.u32 (%p2837_p5), %s2826_s28, 5  ;;  %s2405_s12 = sshll.u32 (%p2837_p5), %s338_s27, 6 }
  0x43   : > { %s345_s25 = scalar_lea.vmem (%p2837_p5), %s3149_s0, %s2470_s5  ;;  %s340_s22 = scalar_lea.vmem (%p2837_p5), [#allocation5], %s2405_s12 }
  0x44   : > { %v358_v0 = vld [vmem:[%s345_s25] sm:$0xff] (%p2837_p5)  ;;  %v360_v1 = vld [vmem:[%s345_s25 + $0x8] sm:$0xff] (%p2837_p5)  ;;  %v362_v2 = vld [vmem:[%s345_s25 + $0x10] sm:$0xff] (%p2837_p5) }
  0x45   : > { %359 = vst [vmem:[%s340_s22] sm:$0xff] (%p2837_p5), %v358_v0  ;;  %361 = vst [vmem:[%s340_s22 + $0x8] sm:$0xff] (%p2837_p5), %v360_v1  ;;  %v364_v3 = vld [vmem:[%s345_s25 + $0x18] sm:$0xff] (%p2837_p5)  ;;  %v366_v4 = vld [vmem:[%s345_s25 + $0x40] sm:$0xff] (%p2837_p5) }
  0x46   : > { %363 = vst [vmem:[%s340_s22 + $0x10] sm:$0xff] %v362_v2  ;;  %v368_v5 = vld [vmem:[%s345_s25 + $0x48] sm:$0xff]  ;;  %365 = vst [vmem:[%s340_s22 + $0x18] sm:$0xff] %v364_v3  ;;  %v370_v6 = vld [vmem:[%s345_s25 + $0x50] sm:$0xff] }
  0x47   : > { %367 = vst [vmem:[%s340_s22 + $0x20] sm:$0xff] %v366_v4  ;;  %369 = vst [vmem:[%s340_s22 + $0x28] sm:$0xff] %v368_v5  ;;  %v372_v7 = vld [vmem:[%s345_s25 + $0x58] sm:$0xff] }
  0x48   : > { %371 = vst [vmem:[%s340_s22 + $0x30] sm:$0xff] %v370_v6  ;;  %373 = vst [vmem:[%s340_s22 + $0x38] sm:$0xff] %v372_v7 }
  0x49 PF: > { %379 = sbr.rel (!%p2855_p11) target bundleno = 81 (0x51), region = 75  ;;  %s381_s9 = sand.u32 (%p2855_p11), 1, %s2668_s16  }
  0x4a   : > { %s2471_s26 = sshll.u32 (%p2855_p11), %s2688_s21, 5  ;;  %s2408_s28 = sshll.u32 (%p2855_p11), %s381_s9, 6 }
  0x4b   : > { %s386_s10 = scalar_lea.vmem (%p2855_p11), %s3150_s1, %s2471_s26  ;;  %s383_s27 = scalar_lea.vmem (%p2855_p11), [#allocation6], %s2408_s28 }
  0x4c   : > { %v399_v8 = vld [vmem:[%s386_s10] sm:$0xff] (%p2855_p11)  ;;  %v401_v9 = vld [vmem:[%s386_s10 + $0x8] sm:$0xff] (%p2855_p11)  ;;  %v403_v10 = vld [vmem:[%s386_s10 + $0x10] sm:$0xff] (%p2855_p11) }
  0x4d   : > { %400 = vst [vmem:[%s383_s27] sm:$0xff] (%p2855_p11), %v399_v8  ;;  %402 = vst [vmem:[%s383_s27 + $0x8] sm:$0xff] (%p2855_p11), %v401_v9  ;;  %v405_v11 = vld [vmem:[%s386_s10 + $0x18] sm:$0xff] (%p2855_p11)  ;;  %v407_v12 = vld [vmem:[%s386_s10 + $0x40] sm:$0xff] (%p2855_p11) }
  0x4e   : > { %404 = vst [vmem:[%s383_s27 + $0x10] sm:$0xff] %v403_v10  ;;  %v409_v13 = vld [vmem:[%s386_s10 + $0x48] sm:$0xff]  ;;  %406 = vst [vmem:[%s383_s27 + $0x18] sm:$0xff] %v405_v11  ;;  %v411_v14 = vld [vmem:[%s386_s10 + $0x50] sm:$0xff] }
  0x4f   : > { %408 = vst [vmem:[%s383_s27 + $0x20] sm:$0xff] %v407_v12  ;;  %410 = vst [vmem:[%s383_s27 + $0x28] sm:$0xff] %v409_v13  ;;  %v413_v15 = vld [vmem:[%s386_s10 + $0x58] sm:$0xff] }
  0x50   : > { %412 = vst [vmem:[%s383_s27 + $0x30] sm:$0xff] %v411_v14  ;;  %414 = vst [vmem:[%s383_s27 + $0x38] sm:$0xff] %v413_v15 }
  0x51 PF: > { %p3183_p5 = scmp.ne.s32.totalorder %s3178_s8, 0 }
  0x52   : > { %s426_s7 = sand.u32 (!%p3183_p5), 1, %s2672_s17   ;;  %s433_s22 = sand.u32 (!%p3183_p5), 1, %s2664_s15  }
  0x53   : > { %423 = sbr.rel (%p3183_p5) target bundleno = 1142 (0x476), region = 98  ;;  %s2412_s5 = sshll.u32 (!%p3183_p5), %s426_s7, 6 }
  0x54   : > { %s2413_s12 = sshll.u32 (!%p3183_p5), %s433_s22, 6  ;;  %s2913_s25 = scalar_lea.vmem (!%p3183_p5), [#allocation5], %s2412_s5 }
  0x55   : > { %s2915_s9 = scalar_lea.vmem (!%p3183_p5), [#allocation6], %s2413_s12 }
  0x58   : > { %2651 = dma.done.wait (%p2885_p4), [#allocation8], 16  }
  0x59   : > { %2653 = vsyncadd (%p2885_p4), [#allocation8], 4294967280 }
  0x5a   : > { %443 = sfence }
  0x5b   : > { %s475_s8 = sand.u32 1, %s2656_s13   ;;  %s2416_s17 = sshll.u32 %s2680_s19, 9 }
  0x5c   : > { %s2415_s15 = sshll.u32 %s475_s8, 6  ;;  %p486_p11 = scmp.eq.s32.totalorder %s2684_s20, 0 }
  0x5d   : > { %p487_p3 = scmp.eq.s32.totalorder %s2680_s19, 0  ;;  %s2927_s26 = scalar_lea.vmem [#allocation9], %s2415_s15 }
  0x5f   : > { %p488_p6 = pnand %p487_p3, %p486_p11 }
  0x61   : > { %491 = sbr.rel (%p488_p6) target bundleno = 109 (0x6d), region = 114 }
  0x66   : > { %vm492_vm0 = vcmask 3072   ;;  %vm501_vm1 = vcmask 0   ;;  %v2699_v16 = vmov 0.0  }
  0x67   : > { %493 = vst.msk [vmem:[#allocation2] sm:$0xf] %vm492_vm0, %v2699_v16  ;;  %494 = vst.msk [vmem:[#allocation2 + $0x4] sm:$0xf] %vm492_vm0, %v2699_v16 }
  0x68   : > { %495 = vst.msk [vmem:[#allocation2 + $0x8] sm:$0xf] %vm492_vm0, %v2699_v16  ;;  %496 = vst.msk [vmem:[#allocation2 + $0xc] sm:$0xf] %vm492_vm0, %v2699_v16 }
  0x69   : > { %497 = vst.msk [vmem:[#allocation2 + $0x10] sm:$0xf] %vm492_vm0, %v2699_v16  ;;  %498 = vst.msk [vmem:[#allocation2 + $0x14] sm:$0xf] %vm492_vm0, %v2699_v16 }
  0x6a   : > { %499 = vst.msk [vmem:[#allocation2 + $0x18] sm:$0xf] %vm492_vm0, %v2699_v16  ;;  %500 = vst.msk [vmem:[#allocation2 + $0x1c] sm:$0xf] %vm492_vm0, %v2699_v16 }
  0x6b   : > { %502 = vst.msk [vmem:[#allocation3] sm:$0x1] %vm501_vm1, %v2699_v16  ;;  %503 = vst.msk [vmem:[#allocation3 + $0x1] sm:$0x1] %vm501_vm1, %v2699_v16 }
  0x6c   : > { %504 = vst.msk [vmem:[#allocation3 + $0x2] sm:$0x1] %vm501_vm1, %v2699_v16  ;;  %505 = vst.msk [vmem:[#allocation3 + $0x3] sm:$0x1] %vm501_vm1, %v2699_v16 }
  0x6d PF: > { %p2417_p1 = scmp.ne.s32.totalorder %s2684_s20, 0 }
  0x6f   : > { %508 = sbr.rel (%p2417_p1) target bundleno = 484 (0x1e4), region = 118 }
  0x74   : > { %v512_v17 = vld [vmem:[%s2913_s25 + $0x8] sm:$0xff]  ;;  %v511_v18 = vld [vmem:[%s2913_s25] sm:$0xff]  ;;  %vm515_vm2 = vcmask 64512   ;;  %v2700_v20 = vmov 0.0   ;;  %v514_v22 = vld [vmem:[%s2913_s25 + $0x18] sm:$0xff]  ;;  %vm810_vm3 = vcmask 1043456  }
  0x75   : > { %v509_v19 = vld [vmem:[%s3151_s2] sm:$0xf]  ;;  %549 = vmatprep.subr.mxu0 %v512_v17  ;;  %583 = vmatprep.mubr.f32.mxu0 %v2700_v20  ;;  %v661_v23 = vld [vmem:[%s2915_s9] sm:$0xff]  ;;  %v513_v24 = vld [vmem:[%s2913_s25 + $0x10] sm:$0xff]  ;;  %vm1203_vm4 = vcmask 3072  }
  0x76   : > { %v662_v21 = vld [vmem:[%s2915_s9 + $0x8] sm:$0xff]  ;;  %550 = vmatpush1.msra.mxu0 %v511_v18  ;;  %620 = vmatprep.subr.mxu1 %v514_v22  ;;  %v664_v25 = vld [vmem:[%s2915_s9 + $0x18] sm:$0xff]  ;;  %v663_v27 = vld [vmem:[%s2915_s9 + $0x10] sm:$0xff] }
  0x77   : > { %2418 = vmatmul.mubr.msk.f32.vlgmr.msra.gmra.mxu0 %vm515_vm2, %v509_v19  ;;  %698 = vmatprep.subr.mxu0 %v662_v21  ;;  %v510_v26 = vld [vmem:[%s3152_s3] sm:$0xf]  ;;  %v2422_v29 = vld [vmem:[%s2913_s25 + $0x20] sm:$0xff]  ;;  %v2425_v30 = vld [vmem:[%s2913_s25 + $0x38] sm:$0xff] }
  0x78   : > { %699 = vmatpush1.msra.mxu0 %v661_v23  ;;  %621 = vmatpush1.msra.mxu1 %v513_v24  ;;  %v2423_v28 = vld [vmem:[%s2913_s25 + $0x28] sm:$0xff]  ;;  %v2424_v32 = vld [vmem:[%s2913_s25 + $0x30] sm:$0xff]  ;;  %v2428_v33 = vld [vmem:[%s2915_s9 + $0x20] sm:$0xff] }
  0x79   : > { %654 = vmatprep.mubr.f32.mxu1 %v2700_v20  ;;  %732 = vmatprep.mubr.f32.mxu0 %v2700_v20  ;;  %v2429_v31 = vld [vmem:[%s2915_s9 + $0x28] sm:$0xff]  ;;  %v2431_v34 = vld [vmem:[%s2915_s9 + $0x38] sm:$0xff]  ;;  %v2430_v35 = vld [vmem:[%s2915_s9 + $0x30] sm:$0xff] }
  0x7a   : > { %2419 = vmatmul.mubr.msk.f32.vlgmr.msra.gmra.mxu1 %vm515_vm2, %v509_v19  ;;  %769 = vmatprep.subr.mxu1 %v664_v25 }
  0x7b   : > { %2420 = vmatmul.mubr.msk.f32.vlgmr.msra.gmra.mxu0 %vm515_vm2, %v510_v26  ;;  %770 = vmatpush1.msra.mxu1 %v663_v27 }
  0x7c   : > { %803 = vmatprep.mubr.f32.mxu1 %v2700_v20  ;;  %894 = vmatprep.subr.mxu0 %v2423_v28 }
  0x7d   : > { %895 = vmatpush1.msra.mxu0 %v2422_v29  ;;  %928 = vmatprep.mubr.f32.mxu0 %v2700_v20 }
  0x7e   : > { %2421 = vmatmul.mubr.msk.f32.vlgmr.msra.gmra.mxu1 %vm515_vm2, %v510_v26  ;;  %965 = vmatprep.subr.mxu1 %v2425_v30 }
  0x7f   : > { %2426 = vmatmul.mubr.msk.f32.vlgmr.msra.gmra.mxu0 %vm515_vm2, %v509_v19  ;;  %1041 = vmatprep.subr.mxu0 %v2429_v31 }
  0x80   : > { %966 = vmatpush1.msra.mxu1 %v2424_v32  ;;  %999 = vmatprep.mubr.f32.mxu1 %v2700_v20 }
  0x81   : > { %1042 = vmatpush1.msra.mxu0 %v2428_v33  ;;  %1075 = vmatprep.mubr.f32.mxu0 %v2700_v20 }
  0x82   : > { %2427 = vmatmul.mubr.msk.f32.vlgmr.msra.gmra.mxu1 %vm515_vm2, %v509_v19  ;;  %1112 = vmatprep.subr.mxu1 %v2431_v34 }
  0x83   : > { %2432 = vmatmul.mubr.msk.f32.vlgmr.msra.gmra.mxu0 %vm515_vm2, %v510_v26  ;;  %1113 = vmatpush1.msra.mxu1 %v2430_v35 }
  0x84   : > { %1146 = vmatprep.mubr.f32.mxu1 %v2700_v20 }
  0x86   : > { %2433 = vmatmul.mubr.msk.f32.vlgmr.msra.gmra.mxu1 %vm515_vm2, %v510_v26 }
 0x137   : > { %v585_v36 = vpop.f32.mrf.mxu0 }
 0x138   : > { %v821_v37 = vmul.f32 %v585_v36, %v585_v36  ;;  %v811_v39 = vsel %vm810_vm3, %v585_v36, 0.0 }
 0x139   : > { %v587_v38 = vpop.f32.mrf.mxu0 }
 0x13a   : > { %v812_v40 = vsel %vm810_vm3, %v587_v38, 0.0  ;;  %v822_v41 = vmul.f32 %v587_v38, %v587_v38  ;;  %v656_v42 = vpop.f32.mrf.mxu1  ;;  %v825_v47 = vsel %vm810_vm3, %v821_v37, 0.0 }
 0x13b   : > { %v813_v43 = vadd.f32 %v812_v40, %v811_v39  ;;  %v814_v44 = vsel %vm810_vm3, %v656_v42, 0.0  ;;  %v823_v45 = vmul.f32 %v656_v42, %v656_v42  ;;  %v734_v46 = vpop.f32.mrf.mxu0 }
 0x13c   : > { %v826_v48 = vsel %vm810_vm3, %v822_v41, 0.0  ;;  %v835_v49 = vsel %vm810_vm3, %v734_v46, 0.0  ;;  %v845_v50 = vmul.f32 %v734_v46, %v734_v46  ;;  %v658_v51 = vpop.f32.mrf.mxu1 }
 0x13d   : > { %v827_v52 = vadd.f32 %v826_v48, %v825_v47  ;;  %v828_v53 = vsel %vm810_vm3, %v823_v45, 0.0  ;;  %v824_v54 = vmul.f32 %v658_v51, %v658_v51  ;;  %v736_v55 = vpop.f32.mrf.mxu0  ;;  %v815_v56 = vadd.f32 %v814_v44, %v813_v43 }
 0x13e   : > { %v849_v57 = vsel %vm810_vm3, %v845_v50, 0.0  ;;  %v836_v58 = vsel %vm810_vm3, %v736_v55, 0.0  ;;  %v846_v59 = vmul.f32 %v736_v55, %v736_v55  ;;  %v805_v60 = vpop.f32.mrf.mxu1  ;;  %v816_v61 = vsel %vm810_vm3, %v658_v51, 0.0 }
 0x13f   : > { %v837_v62 = vadd.f32 %v836_v58, %v835_v49  ;;  %v838_v63 = vsel %vm810_vm3, %v805_v60, 0.0  ;;  %v847_v0 = vmul.f32 %v805_v60, %v805_v60  ;;  %v930_v1 = vpop.f32.mrf.mxu0  ;;  %v817_v2 = vadd.f32 %v816_v61, %v815_v56 }
 0x140   : > { %v850_v3 = vsel %vm810_vm3, %v846_v59, 0.0  ;;  %v1153_v4 = vsel %vm810_vm3, %v930_v1, 0.0  ;;  %v1163_v5 = vmul.f32 %v930_v1, %v930_v1  ;;  %v807_v6 = vpop.f32.mrf.mxu1  ;;  %v829_v7 = vadd.f32 %v828_v53, %v827_v52 }
 0x141   : > { %v851_v8 = vadd.f32 %v850_v3, %v849_v57  ;;  %v852_v9 = vsel %vm810_vm3, %v847_v0, 0.0  ;;  %818 = vadd.xlane.f32.xlu0 %v817_v2  ;;  %v932_v10 = vpop.f32.mrf.mxu0  ;;  %v830_v11 = vsel %vm810_vm3, %v824_v54, 0.0  ;;  %v839_v21 = vadd.f32 %v838_v63, %v837_v62  ;;  %v1201_v63 = vld [vmem:[#allocation2] sm:$0xf] }
 0x142   : > { %v1167_v12 = vsel %vm810_vm3, %v1163_v5, 0.0  ;;  %v1154_v13 = vsel %vm810_vm3, %v932_v10, 0.0  ;;  %v1164_v14 = vmul.f32 %v932_v10, %v932_v10  ;;  %v1001_v15 = vpop.f32.mrf.mxu1  ;;  %v831_v16 = vadd.f32 %v830_v11, %v829_v7 }
 0x143   : > { %v1155_v17 = vadd.f32 %v1154_v13, %v1153_v4  ;;  %v1156_v18 = vsel %vm810_vm3, %v1001_v15, 0.0  ;;  %v1165_v19 = vmul.f32 %v1001_v15, %v1001_v15  ;;  %v1077_v20 = vpop.f32.mrf.mxu0  ;;  %v848_v22 = vmul.f32 %v807_v6, %v807_v6  ;;  %v1210_v4 = vld [vmem:[#allocation2 + $0x8] sm:$0xf] }
 0x144   : > { %v1168_v23 = vsel %vm810_vm3, %v1164_v14, 0.0  ;;  %v1177_v24 = vsel %vm810_vm3, %v1077_v20, 0.0  ;;  %v1187_v25 = vmul.f32 %v1077_v20, %v1077_v20  ;;  %v1003_v26 = vpop.f32.mrf.mxu1  ;;  %v840_v31 = vsel %vm810_vm3, %v807_v6, 0.0 }
 0x145   : > { %v1169_v27 = vadd.f32 %v1168_v23, %v1167_v12  ;;  %v1157_v28 = vadd.f32 %v1156_v18, %v1155_v17  ;;  %v1158_v29 = vsel %vm810_vm3, %v1003_v26, 0.0  ;;  %832 = vadd.xlane.f32.xlu0 %v831_v16  ;;  %v1079_v30 = vpop.f32.mrf.mxu0  ;;  %v1170_v32 = vsel %vm810_vm3, %v1165_v19, 0.0  ;;  %v1214_v12 = vld [vmem:[#allocation2 + $0xc] sm:$0xf] }
 0x146   : > { %v1191_v33 = vsel %vm810_vm3, %v1187_v25, 0.0  ;;  %v1178_v34 = vsel %vm810_vm3, %v1079_v30, 0.0  ;;  %v1188_v35 = vmul.f32 %v1079_v30, %v1079_v30  ;;  %v1148_v36 = vpop.f32.mrf.mxu1  ;;  %v1166_v37 = vmul.f32 %v1003_v26, %v1003_v26 }
 0x147   : > { %v1179_v38 = vadd.f32 %v1178_v34, %v1177_v24  ;;  %v841_v39 = vadd.f32 %v840_v31, %v839_v21  ;;  %v1180_v40 = vsel %vm810_vm3, %v1148_v36, 0.0  ;;  %v1189_v42 = vmul.f32 %v1148_v36, %v1148_v36 }
 0x148   : > { %v1192_v41 = vsel %vm810_vm3, %v1188_v35, 0.0  ;;  %v1150_v43 = vpop.f32.mrf.mxu1  ;;  %v1159_v44 = vadd.f32 %v1158_v29, %v1157_v28  ;;  %v853_v45 = vadd.f32 %v852_v9, %v851_v8  ;;  %v854_v48 = vsel %vm810_vm3, %v848_v22, 0.0  ;;  %v1206_v8 = vld [vmem:[#allocation2 + $0x4] sm:$0xf] }
 0x149   : > { %842 = vadd.xlane.f32.xlu1 %v841_v39  ;;  %v1181_v46 = vadd.f32 %v1180_v40, %v1179_v38  ;;  %v1182_v47 = vsel %vm810_vm3, %v1150_v43, 0.0  ;;  %v1193_v49 = vadd.f32 %v1192_v41, %v1191_v33  ;;  %v1171_v52 = vadd.f32 %v1170_v32, %v1169_v27 }
 0x14a   : > { %1160 = vadd.xlane.f32.xlu0 %v1159_v44  ;;  %v855_v50 = vadd.f32 %v854_v48, %v853_v45  ;;  %v1194_v53 = vsel %vm810_vm3, %v1189_v42, 0.0  ;;  %v1190_v54 = vmul.f32 %v1150_v43, %v1150_v43  ;;  %v1172_v55 = vsel %vm810_vm3, %v1166_v37, 0.0 }
 0x14b   : > { %v1183_v51 = vadd.f32 %v1182_v47, %v1181_v46  ;;  %v1173_v56 = vadd.f32 %v1172_v55, %v1171_v52  ;;  %v1195_v57 = vadd.f32 %v1194_v53, %v1193_v49 }
 0x14c   : > { %v1196_v58 = vsel %vm810_vm3, %v1190_v54, 0.0 }
 0x14d   : > { %856 = vadd.xlane.f32.xlu1 %v855_v50  ;;  %v1197_v59 = vadd.f32 %v1196_v58, %v1195_v57 }
 0x14e   : > { %1184 = vadd.xlane.f32.xlu0 %v1183_v51 }
 0x151   : > { %1174 = vadd.xlane.f32.xlu1 %v1173_v56 }
 0x155   : > { %1198 = vadd.xlane.f32.xlu1 %v1197_v59 }
 0x1ca   : > { %v819_v60 = vpop.xlane.xlu0 %818 }
 0x1ce   : > { %v833_v61 = vpop.xlane.xlu0 %832 }
 0x1d2   : > { %v843_v62 = vpop.xlane.xlu1 %842 }
 0x1d3   : > { %v1161_v0 = vpop.xlane.xlu0 %1160 }
 0x1d4   : > { %v1162_v1 = vadd.f32 %v1161_v0, %v819_v60 }
 0x1d6   : > { %v1202_v2 = vadd.f32 %v1201_v63, %v1162_v1  ;;  %v857_v3 = vpop.xlane.xlu1 %856 }
 0x1d7   : > { %v1185_v5 = vpop.xlane.xlu0 %1184 }
 0x1d8   : > { %1204 = vst.msk [vmem:[#allocation2] sm:$0xf] %vm1203_vm4, %v1202_v2  ;;  %v1186_v6 = vadd.f32 %v1185_v5, %v843_v62 }
 0x1da   : > { %v1211_v7 = vadd.f32 %v1210_v4, %v1186_v6  ;;  %v1175_v9 = vpop.xlane.xlu1 %1174 }
 0x1db   : > { %v1176_v10 = vadd.f32 %v1175_v9, %v833_v61 }
 0x1dc   : > { %1212 = vst.msk [vmem:[#allocation2 + $0x8] sm:$0xf] %vm1203_vm4, %v1211_v7 }
 0x1dd   : > { %v1207_v11 = vadd.f32 %v1206_v8, %v1176_v10 }
 0x1de   : > { %v1199_v13 = vpop.xlane.xlu1 %1198 }
 0x1df   : > { %1208 = vst.msk [vmem:[#allocation2 + $0x4] sm:$0xf] %vm1203_vm4, %v1207_v11  ;;  %v1200_v14 = vadd.f32 %v1199_v13, %v857_v3 }
 0x1e1   : > { %v1215_v15 = vadd.f32 %v1214_v12, %v1200_v14 }
 0x1e3   : > { %1216 = vst.msk [vmem:[#allocation2 + $0xc] sm:$0xf] %vm1203_vm4, %v1215_v15 }
 0x1e4 PF: > { %p1217_p4 = scmp.eq.s32.totalorder %s2684_s20, 1 }
 0x1e6   : > { %p1218_p7 = pnand %p1217_p4, %p487_p3 }
 0x1e7   : > { %s3184_s12 = sld [smem:[#allocation17_spill]] (!%p1218_p7) }
 0x1e8   : > { %1221 = sbr.rel (%p1218_p7) target bundleno = 526 (0x20e), region = 122  ;;  %s3185_s13 = sld [smem:[#allocation18_spill]] (!%p1218_p7) }
 0x1ed   : > { %v1224_v16 = vld [vmem:[#allocation2] sm:$0xf]  ;;  %v1227_v17 = vld [vmem:[#allocation2 + $0x4] sm:$0xf]  ;;  %v1245_v20 = vld [vmem:[#allocation2 + $0x8] sm:$0xf] }
 0x1ee   : > { %v1225_v18 = vmul.f32 0.00048828125, %v1224_v16  ;;  %v1228_v19 = vmul.f32 0.00048828125, %v1227_v17  ;;  %v1248_v21 = vld [vmem:[#allocation2 + $0xc] sm:$0xf]  ;;  %v1246_v23 = vmul.f32 0.00048828125, %v1245_v20  ;;  %vm1236_vm5 = vcmask 3072  }
 0x1ef   : > { %v1249_v24 = vmul.f32 0.00048828125, %v1248_v21  ;;  %v1222_v32 = vld [vmem:[%s3153_s4] sm:$0xf] }
 0x1f0   : > { %v1229_v22 = vmul.f32 %v1225_v18, %v1225_v18  ;;  %v1250_v26 = vmul.f32 %v1246_v23, %v1246_v23  ;;  %v1242_v34 = vld [vmem:[%s3155_s6] sm:$0xf] }
 0x1f1   : > { %v1223_v37 = vld [vmem:[%s3184_s12] sm:$0xf] }
 0x1f2   : > { %v1230_v25 = vsub.f32 %v1228_v19, %v1229_v22  ;;  %v1251_v28 = vsub.f32 %v1249_v24, %v1250_v26  ;;  %v1243_v40 = vld [vmem:[%s3185_s13] sm:$0xf] }
 0x1f4   : > { %v1231_v27 = vmax.f32 %v1230_v25, 0.0  ;;  %v1252_v30 = vmax.f32 %v1251_v28, 0.0 }
 0x1f6   : > { %v1232_v29 = vadd.f32 1e-05, %v1231_v27  ;;  %v1253_v31 = vadd.f32 1e-05, %v1252_v30 }
 0x1f8   : > { %2578 = vrsqrt.f32 %v1232_v29 }
 0x1f9   : > { %2580 = vrsqrt.f32 %v1253_v31 }
 0x205   : > { %v2579_v33 = vpop.eup %2578 }
 0x206   : > { %v1234_v35 = vmul.f32 %v2579_v33, %v1222_v32  ;;  %v2581_v36 = vpop.eup %2580 }
 0x207   : > { %v1255_v39 = vmul.f32 %v2581_v36, %v1242_v34 }
 0x208   : > { %1237 = vst.msk [vmem:[#allocation2 + $0x10] sm:$0xf] %vm1236_vm5, %v1234_v35  ;;  %v1238_v38 = vmul.f32 %v1234_v35, %v1225_v18 }
 0x209   : > { %1257 = vst.msk [vmem:[#allocation2 + $0x18] sm:$0xf] %vm1236_vm5, %v1255_v39  ;;  %v1258_v42 = vmul.f32 %v1255_v39, %v1246_v23 }
 0x20a   : > { %v1239_v41 = vsub.f32 %v1223_v37, %v1238_v38 }
 0x20b   : > { %v1259_v43 = vsub.f32 %v1243_v40, %v1258_v42 }
 0x20c   : > { %1241 = vst.msk [vmem:[#allocation2 + $0x14] sm:$0xf] %vm1236_vm5, %v1239_v41 }
 0x20d   : > { %1261 = vst.msk [vmem:[#allocation2 + $0x1c] sm:$0xf] %vm1236_vm5, %v1259_v43 }
 0x20e PF: > { %p2434_p8 = scmp.ne.s32.totalorder %s2684_s20, 1 }
 0x20f   : > { %s3186_s27 = sld [smem:[#allocation19_spill]] (!%p2434_p8)  ;;  %s3064_s7 = sshra.s32 (!%p2434_p8), %s2416_s17, 7 }
 0x210   : > { %1264 = sbr.rel (%p2434_p8) target bundleno = 918 (0x396), region = 126  ;;  %s2439_s22 = sshll.u32 (!%p2434_p8), %s3064_s7, 1 }
 0x211   : > { %s1689_s5 = scalar_lea.vmem (!%p2434_p8), [#allocation4], %s2439_s22 }
 0x215   : > { %v1277_v44 = vld [vmem:[%s2913_s25 + $0x8] sm:$0xff]  ;;  %v1279_v45 = vld [vmem:[%s2913_s25 + $0x18] sm:$0xff]  ;;  %v1276_v46 = vld [vmem:[%s2913_s25] sm:$0xff]  ;;  %vm1280_vm6 = vcmask 64512   ;;  %v2701_v49 = vmov 0.0   ;;  %v2702_v1 = vmov 0   ;;  %v1666_v28 = vlaneseq }
 0x216   : > { %1314 = vmatprep.subr.mxu0 %v1277_v44  ;;  %1385 = vmatprep.subr.mxu1 %v1279_v45  ;;  %v1278_v47 = vld [vmem:[%s2913_s25 + $0x10] sm:$0xff]  ;;  %v1265_v48 = vld [vmem:[%s3151_s2] sm:$0xf]  ;;  %v1429_v51 = vld [vmem:[%s2915_s9 + $0x18] sm:$0xff]  ;;  %v2703_v26 = vmov 1966171168  }
 0x217   : > { %1315 = vmatpush1.msra.mxu0 %v1276_v46  ;;  %1348 = vmatprep.mubr.f32.mxu0 %v2701_v49  ;;  %v1427_v50 = vld [vmem:[%s2915_s9 + $0x8] sm:$0xff]  ;;  %v1426_v52 = vld [vmem:[%s2915_s9] sm:$0xff]  ;;  %v1428_v53 = vld [vmem:[%s2915_s9 + $0x10] sm:$0xff]  ;;  %v3045_v27 = vunpack.c.l.s4 %v2703_v26  ;;  %vm1628_vm7 = vcmask 1043456   ;;  %v3049_v45 = vshrl.u32 %v1666_v28, 7  ;;  %vm3068_vm8 = vcmp.lt.s32.totalorder %v1666_v28, 512 }
 0x218   : > { %1386 = vmatpush1.msra.mxu1 %v1278_v47  ;;  %1419 = vmatprep.mubr.f32.mxu1 %v2701_v49  ;;  %v1266_v54 = vld [vmem:[%s3152_s3] sm:$0xf]  ;;  %v2443_v56 = vld [vmem:[%s2913_s25 + $0x38] sm:$0xff]  ;;  %v2440_v57 = vld [vmem:[%s2913_s25 + $0x20] sm:$0xff]  ;;  %vm2110_vm9 = vcmask 0  }
 0x219   : > { %2435 = vmatmul.mubr.msk.f32.vlgmr.msra.gmra.mxu0 %vm1280_vm6, %v1265_v48  ;;  %2436 = vmatmul.mubr.msk.f32.vlgmr.msra.gmra.mxu1 %vm1280_vm6, %v1265_v48  ;;  %v2441_v55 = vld [vmem:[%s2913_s25 + $0x28] sm:$0xff]  ;;  %v2442_v58 = vld [vmem:[%s2913_s25 + $0x30] sm:$0xff]  ;;  %v2449_v60 = vld [vmem:[%s2915_s9 + $0x38] sm:$0xff]  ;;  %v1665_v44 = vunpack.c.0.s8 %v3045_v27 }
 0x21a   : > { %1463 = vmatprep.subr.mxu0 %v1427_v50  ;;  %1534 = vmatprep.subr.mxu1 %v1429_v51  ;;  %v2447_v59 = vld [vmem:[%s2915_s9 + $0x28] sm:$0xff]  ;;  %v2446_v61 = vld [vmem:[%s2915_s9 + $0x20] sm:$0xff]  ;;  %v2448_v62 = vld [vmem:[%s2915_s9 + $0x30] sm:$0xff] }
 0x21b   : > { %1464 = vmatpush1.msra.mxu0 %v1426_v52  ;;  %1497 = vmatprep.mubr.f32.mxu0 %v2701_v49  ;;  %v1269_v63 = vld [vmem:[#allocation2 + $0x10] sm:$0xf]  ;;  %v1273_v0 = vld [vmem:[#allocation2 + $0x18] sm:$0xf]  ;;  %v1271_v2 = vld [vmem:[#allocation2 + $0x14] sm:$0xf] }
 0x21c   : > { %1535 = vmatpush1.msra.mxu1 %v1428_v53  ;;  %1568 = vmatprep.mubr.f32.mxu1 %v2701_v49  ;;  %v1275_v3 = vld [vmem:[#allocation2 + $0x1c] sm:$0xf]  ;;  %v1267_v4 = vld [vmem:[%s3186_s27] sm:$0xf] }
 0x21d   : > { %2437 = vmatmul.mubr.msk.f32.vlgmr.msra.gmra.mxu0 %vm1280_vm6, %v1266_v54  ;;  %2438 = vmatmul.mubr.msk.f32.vlgmr.msra.gmra.mxu1 %vm1280_vm6, %v1266_v54 }
 0x21e   : > { %1746 = vmatprep.subr.mxu0 %v2441_v55  ;;  %1817 = vmatprep.subr.mxu1 %v2443_v56 }
 0x21f   : > { %1747 = vmatpush1.msra.mxu0 %v2440_v57  ;;  %1780 = vmatprep.mubr.f32.mxu0 %v2701_v49 }
 0x220   : > { %1818 = vmatpush1.msra.mxu1 %v2442_v58  ;;  %1851 = vmatprep.mubr.f32.mxu1 %v2701_v49 }
 0x221   : > { %2444 = vmatmul.mubr.msk.f32.vlgmr.msra.gmra.mxu0 %vm1280_vm6, %v1265_v48  ;;  %2445 = vmatmul.mubr.msk.f32.vlgmr.msra.gmra.mxu1 %vm1280_vm6, %v1265_v48 }
 0x222   : > { %1893 = vmatprep.subr.mxu0 %v2447_v59  ;;  %1964 = vmatprep.subr.mxu1 %v2449_v60 }
 0x223   : > { %1894 = vmatpush1.msra.mxu0 %v2446_v61  ;;  %1927 = vmatprep.mubr.f32.mxu0 %v2701_v49 }
 0x224   : > { %1965 = vmatpush1.msra.mxu1 %v2448_v62  ;;  %1998 = vmatprep.mubr.f32.mxu1 %v2701_v49 }
 0x225   : > { %2450 = vmatmul.mubr.msk.f32.vlgmr.msra.gmra.mxu0 %vm1280_vm6, %v1266_v54  ;;  %2451 = vmatmul.mubr.msk.f32.vlgmr.msra.gmra.mxu1 %vm1280_vm6, %v1266_v54 }
 0x226   : > { %2582 = vset.pattern.permute.xlu0 %v2702_v1  ;;  %2583 = vset.pattern.permute.xlu1 %v2702_v1 }
 0x227   : > { %1577 = vperm.xlu0 %2582, %v1269_v63   ;;  %1595 = vperm.xlu1 %2583, %v1273_v0  }
 0x22b   : > { %1586 = vperm.xlu0 %2582, %v1271_v2   ;;  %1608 = vperm.xlu1 %2583, %v1275_v3  }
 0x22f   : > { %1621 = vperm.xlu0 %2582, %v1267_v4  }
 0x2a2   : > { %v1578_v5 = vpop.permute.xlu0 %1577  ;;  %v1596_v11 = vpop.permute.xlu1 %1595 }
 0x2a6   : > { %v1587_v10 = vpop.permute.xlu0 %1586  ;;  %v1609_v33 = vpop.permute.xlu1 %1608 }
 0x2aa   : > { %v1622_v56 = vpop.permute.xlu0 %1621 }
 0x2d9   : > { %v1350_v6 = vpop.f32.mrf.mxu0  ;;  %v1421_v7 = vpop.f32.mrf.mxu1 }
 0x2da   : > { %v1580_v8 = vmul.f32 %v1578_v5, %v1350_v6  ;;  %v1582_v9 = vmul.f32 %v1578_v5, %v1421_v7 }
 0x2db   : > { %v1352_v12 = vpop.f32.mrf.mxu0  ;;  %v1423_v13 = vpop.f32.mrf.mxu1 }
 0x2dc   : > { %v1581_v14 = vmul.f32 %v1578_v5, %v1352_v12  ;;  %v1583_v15 = vmul.f32 %v1578_v5, %v1423_v13  ;;  %v1591_v16 = vadd.f32 %v1587_v10, %v1582_v9  ;;  %v1589_v19 = vadd.f32 %v1587_v10, %v1580_v8 }
 0x2dd   : > { %v1499_v17 = vpop.f32.mrf.mxu0  ;;  %v1570_v18 = vpop.f32.mrf.mxu1 }
 0x2de   : > { %v1598_v20 = vmul.f32 %v1596_v11, %v1499_v17  ;;  %v1600_v21 = vmul.f32 %v1596_v11, %v1570_v18  ;;  %v1592_v22 = vadd.f32 %v1587_v10, %v1583_v15  ;;  %v1590_v24 = vadd.f32 %v1587_v10, %v1581_v14 }
 0x2df   : > { %v1501_v23 = vpop.f32.mrf.mxu0  ;;  %v1572_v25 = vpop.f32.mrf.mxu1 }
 0x2e0   : > { %v1602_v29 = vadd.f32 %v1598_v20, %v1589_v19  ;;  %v1604_v30 = vadd.f32 %v1600_v21, %v1591_v16  ;;  %v1599_v31 = vmul.f32 %v1596_v11, %v1501_v23  ;;  %v1601_v32 = vmul.f32 %v1596_v11, %v1572_v25 }
 0x2e1   : > { %v1782_v34 = vpop.f32.mrf.mxu0  ;;  %v1853_v35 = vpop.f32.mrf.mxu1 }
 0x2e2   : > { %v1603_v36 = vadd.f32 %v1599_v31, %v1590_v24  ;;  %v1605_v37 = vadd.f32 %v1601_v32, %v1592_v22  ;;  %v2005_v38 = vmul.f32 %v1782_v34, %v1578_v5  ;;  %v2007_v39 = vmul.f32 %v1853_v35, %v1578_v5 }
 0x2e3   : > { %v1784_v40 = vpop.f32.mrf.mxu0  ;;  %v1855_v41 = vpop.f32.mrf.mxu1  ;;  %v1611_v42 = vadd.f32 %v1609_v33, %v1602_v29  ;;  %v1613_v43 = vadd.f32 %v1609_v33, %v1604_v30 }
 0x2e4   : > { %v2009_v46 = vadd.f32 %v2005_v38, %v1587_v10  ;;  %v2011_v47 = vadd.f32 %v2007_v39, %v1587_v10  ;;  %v2006_v48 = vmul.f32 %v1784_v40, %v1578_v5  ;;  %v2008_v49 = vmul.f32 %v1855_v41, %v1578_v5 }
 0x2e5   : > { %v1929_v50 = vpop.f32.mrf.mxu0  ;;  %v2000_v51 = vpop.f32.mrf.mxu1  ;;  %v1612_v52 = vadd.f32 %v1609_v33, %v1603_v36  ;;  %v1614_v53 = vadd.f32 %v1609_v33, %v1605_v37  ;;  %v1615_v54 = vmax.f32 %v1611_v42, 0.0  ;;  %v1617_v55 = vmax.f32 %v1613_v43, 0.0 }
 0x2e6   : > { %v2010_v57 = vadd.f32 %v2006_v48, %v1587_v10  ;;  %v2012_v58 = vadd.f32 %v2008_v49, %v1587_v10  ;;  %v2013_v59 = vmul.f32 %v1929_v50, %v1596_v11  ;;  %v2015_v60 = vmul.f32 %v2000_v51, %v1596_v11 }
 0x2e7   : > { %v1931_v61 = vpop.f32.mrf.mxu0  ;;  %v2002_v62 = vpop.f32.mrf.mxu1  ;;  %v1616_v63 = vmax.f32 %v1612_v52, 0.0  ;;  %v1618_v0 = vmax.f32 %v1614_v53, 0.0  ;;  %v1624_v1 = vmul.f32 %v1622_v56, %v1615_v54  ;;  %v1626_v2 = vmul.f32 %v1622_v56, %v1617_v55 }
 0x2e8   : > { %v2017_v3 = vadd.f32 %v2013_v59, %v2009_v46  ;;  %v2019_v4 = vadd.f32 %v2015_v60, %v2011_v47  ;;  %v2014_v5 = vmul.f32 %v1931_v61, %v1596_v11  ;;  %v2016_v6 = vmul.f32 %v2002_v62, %v1596_v11 }
 0x2e9   : > { %v1625_v7 = vmul.f32 %v1622_v56, %v1616_v63  ;;  %v1627_v8 = vmul.f32 %v1622_v56, %v1618_v0  ;;  %v1629_v9 = vsel %vm1628_vm7, %v1624_v1, 0.0  ;;  %v1643_v12 = vsel %vm1628_vm7, %v1626_v2, 0.0 }
 0x2ea   : > { %v2021_v13 = vadd.f32 %v2017_v3, %v1609_v33  ;;  %v2023_v10 = vadd.f32 %v2019_v4, %v1609_v33  ;;  %v2018_v14 = vadd.f32 %v2014_v5, %v2010_v57  ;;  %v2020_v15 = vadd.f32 %v2016_v6, %v2012_v58 }
 0x2eb   : > { %v1630_v16 = vrot.slane %v1629_v9, 4  ;;  %v1636_v17 = vsel %vm1628_vm7, %v1625_v7, 0.0  ;;  %v1644_v18 = vrot.slane %v1643_v12, 4  ;;  %v1650_v19 = vsel %vm1628_vm7, %v1627_v8, 0.0 }
 0x2ec   : > { %v2025_v20 = vmax.f32 %v2021_v13, 0.0  ;;  %v2027_v21 = vmax.f32 %v2023_v10, 0.0  ;;  %v2022_v22 = vadd.f32 %v2018_v14, %v1609_v33  ;;  %v2024_v11 = vadd.f32 %v2020_v15, %v1609_v33 }
 0x2ed   : > { %v1631_v23 = vadd.f32 %v1630_v16, %v1629_v9  ;;  %v1637_v24 = vrot.slane %v1636_v17, 4  ;;  %v1645_v25 = vadd.f32 %v1644_v18, %v1643_v12  ;;  %v1651_v26 = vrot.slane %v1650_v19, 4 }
 0x2ee   : > { %v2029_v29 = vmul.f32 %v2025_v20, %v1622_v56  ;;  %v2031_v30 = vmul.f32 %v2027_v21, %v1622_v56  ;;  %v2026_v31 = vmax.f32 %v2022_v22, 0.0  ;;  %v2028_v32 = vmax.f32 %v2024_v11, 0.0 }
 0x2ef   : > { %v1632_v34 = vrot.slane %v1631_v23, 2  ;;  %v1638_v35 = vadd.f32 %v1637_v24, %v1636_v17  ;;  %v1646_v36 = vrot.slane %v1645_v25, 2  ;;  %v1652_v37 = vadd.f32 %v1651_v26, %v1650_v19 }
 0x2f0   : > { %v2033_v38 = vsel %vm1628_vm7, %v2029_v29, 0.0  ;;  %v2047_v39 = vsel %vm1628_vm7, %v2031_v30, 0.0  ;;  %v2030_v40 = vmul.f32 %v2026_v31, %v1622_v56  ;;  %v2032_v41 = vmul.f32 %v2028_v32, %v1622_v56 }
 0x2f1   : > { %v2034_v42 = vrot.slane %v2033_v38, 4  ;;  %v2048_v33 = vrot.slane %v2047_v39, 4  ;;  %v1633_v43 = vadd.f32 %v1632_v34, %v1631_v23  ;;  %v1639_v46 = vrot.slane %v1638_v35, 2 }
 0x2f2   : > { %v2040_v47 = vsel %vm1628_vm7, %v2030_v40, 0.0  ;;  %v2054_v48 = vsel %vm1628_vm7, %v2032_v41, 0.0  ;;  %v1647_v49 = vadd.f32 %v1646_v36, %v1645_v25  ;;  %v1653_v50 = vrot.slane %v1652_v37, 2 }
 0x2f3   : > { %v2035_v51 = vadd.f32 %v2034_v42, %v2033_v38  ;;  %v2049_v52 = vadd.f32 %v2048_v33, %v2047_v39  ;;  %v2041_v53 = vrot.slane %v2040_v47, 4  ;;  %v2055_v54 = vrot.slane %v2054_v48, 4 }
 0x2f4   : > { %v1634_v55 = vrot.slane %v1633_v43, 1  ;;  %v1640_v57 = vadd.f32 %v1639_v46, %v1638_v35  ;;  %v1648_v58 = vrot.slane %v1647_v49, 1  ;;  %v1654_v59 = vadd.f32 %v1653_v50, %v1652_v37 }
 0x2f5   : > { %v2036_v60 = vrot.slane %v2035_v51, 2  ;;  %v2042_v56 = vadd.f32 %v2041_v53, %v2040_v47  ;;  %v2050_v61 = vrot.slane %v2049_v52, 2  ;;  %v2056_v62 = vadd.f32 %v2055_v54, %v2054_v48 }
 0x2f6   : > { %v1635_v63 = vadd.f32 %v1634_v55, %v1633_v43  ;;  %v1641_v0 = vrot.slane %v1640_v57, 1  ;;  %v1649_v1 = vadd.f32 %v1648_v58, %v1647_v49  ;;  %v1655_v2 = vrot.slane %v1654_v59, 1  ;;  %v2108_v55 = vld [vmem:[#allocation3] sm:$0x1] }
 0x2f7   : > { %v2043_v3 = vrot.slane %v2042_v56, 2  ;;  %v2037_v4 = vadd.f32 %v2036_v60, %v2035_v51  ;;  %v2051_v5 = vadd.f32 %v2050_v61, %v2049_v52  ;;  %v2057_v6 = vrot.slane %v2056_v62, 2 }
 0x2f8   : > { %v1642_v7 = vadd.f32 %v1641_v0, %v1640_v57  ;;  %v1656_v8 = vadd.f32 %v1655_v2, %v1654_v59  ;;  %v1668_v9 = vsub.s32 %v1665_v44, %v3049_v45  ;;  %v1701_v12 = vmul.f32 %v1635_v63, %v1635_v63  ;;  %v2113_v59 = vld [vmem:[#allocation3 + $0x1] sm:$0x1] }
 0x2f9   : > { %v2038_v13 = vrot.slane %v2037_v4, 1  ;;  %v2044_v10 = vadd.f32 %v2043_v3, %v2042_v56  ;;  %v2052_v14 = vrot.slane %v2051_v5, 1  ;;  %v2058_v15 = vadd.f32 %v2057_v6, %v2056_v62 }
 0x2fa   : > { %v1662_v16 = vcombine.low %v1649_v1, %v1656_v8  ;;  %v1695_v17 = vadd.f32 %v1642_v7, %v1635_v63  ;;  %v1661_v18 = vcombine.low %v1635_v63, %v1642_v7  ;;  %v1702_v19 = vmul.f32 %v1642_v7, %v1642_v7 }
 0x2fb   : > { %v1703_v20 = vmul.f32 %v1649_v1, %v1649_v1  ;;  %v2039_v21 = vadd.f32 %v2038_v13, %v2037_v4  ;;  %v2045_v22 = vrot.slane %v2044_v10, 1  ;;  %v1704_v24 = vmul.f32 %v1656_v8, %v1656_v8 }
 0x2fc   : > { %v1676_v11 = vrot.slane %v1662_v16, %v1668_v9  ;;  %v1696_v27 = vadd.f32 %v1695_v17, %v1649_v1  ;;  %v1669_v44 = vrot.slane %v1661_v18, %v1668_v9  ;;  %v1705_v45 = vadd.f32 %v1702_v19, %v1701_v12 }
 0x2fd   : > { %v2046_v25 = vadd.f32 %v2045_v22, %v2044_v10  ;;  %v2059_v26 = vrot.slane %v2058_v15, 1  ;;  %v2053_v32 = vadd.f32 %v2052_v14, %v2051_v5  ;;  %v2098_v40 = vmul.f32 %v2039_v21, %v2039_v21 }
 0x2fe   : > { %v1697_v29 = vadd.f32 %v1696_v27, %v1656_v8  ;;  %v1677_v30 = vcombine.low %v1669_v44, %v1676_v11  ;;  %v1706_v31 = vadd.f32 %v1705_v45, %v1703_v20 }
 0x2ff   : > { %v2060_v34 = vadd.f32 %v2059_v26, %v2058_v15  ;;  %v2065_v35 = vcombine.low %v2039_v21, %v2046_v25  ;;  %v2092_v36 = vadd.f32 %v2046_v25, %v2039_v21  ;;  %v2099_v37 = vmul.f32 %v2046_v25, %v2046_v25 }
 0x300   : > { %1698 = vadd.xlane.f32.xlu1 %v1697_v29  ;;  %v1684_v38 = vrot.slane %v1677_v30, %v1668_v9  ;;  %v1707_v39 = vadd.f32 %v1706_v31, %v1704_v24  ;;  %v2100_v33 = vmul.f32 %v2053_v32, %v2053_v32 }
 0x301   : > { %v2066_v41 = vcombine.low %v2053_v32, %v2060_v34  ;;  %v2073_v28 = vrot.slane %v2065_v35, %v1668_v9  ;;  %v2093_v42 = vadd.f32 %v2092_v36, %v2053_v32  ;;  %v2102_v43 = vadd.f32 %v2099_v37, %v2098_v40 }
 0x302   : > { %1694 = vst.msk [vmem:[%s1689_s5] ss:$2 sm:$0xf] %vm3068_vm8, %v1684_v38  ;;  %1708 = vadd.xlane.f32.xlu0 %v1707_v39  ;;  %v2101_v48 = vmul.f32 %v2060_v34, %v2060_v34 }
 0x303   : > { %v2080_v46 = vrot.slane %v2066_v41, %v1668_v9  ;;  %v2094_v47 = vadd.f32 %v2093_v42, %v2060_v34  ;;  %v2103_v49 = vadd.f32 %v2102_v43, %v2100_v33 }
 0x305   : > { %v2081_v50 = vcombine.low %v2073_v28, %v2080_v46  ;;  %v2104_v51 = vadd.f32 %v2103_v49, %v2101_v48 }
 0x306   : > { %2095 = vadd.xlane.f32.xlu0 %v2094_v47 }
 0x307   : > { %v2088_v52 = vrot.slane %v2081_v50, %v1668_v9  ;;  %2105 = vadd.xlane.f32.xlu1 %v2104_v51 }
 0x309   : > { %2452 = vst.msk [vmem:[%s1689_s5 + $0x1] ss:$2 sm:$0xf] %vm3068_vm8, %v2088_v52 }
 0x389   : > { %v1699_v54 = vpop.xlane.xlu1 %1698 }
 0x38b   : > { %v1709_v53 = vpop.xlane.xlu0 %1708 }
 0x38f   : > { %v2096_v57 = vpop.xlane.xlu0 %2095 }
 0x390   : > { %v2097_v58 = vadd.f32 %v2096_v57, %v1699_v54  ;;  %v2106_v60 = vpop.xlane.xlu1 %2105 }
 0x391   : > { %v2107_v61 = vadd.f32 %v2106_v60, %v1709_v53 }
 0x392   : > { %v2109_v56 = vadd.f32 %v2108_v55, %v2097_v58 }
 0x393   : > { %v2114_v62 = vadd.f32 %v2113_v59, %v2107_v61 }
 0x394   : > { %2111 = vst.msk [vmem:[#allocation3] sm:$0x1] %vm2110_vm9, %v2109_v56 }
 0x395   : > { %2115 = vst.msk [vmem:[#allocation3 + $0x1] sm:$0x1] %vm2110_vm9, %v2114_v62 }
 0x396 PF: > { %p2116_p9 = scmp.eq.s32.totalorder %s2684_s20, 2 }
 0x398   : > { %p2117_p10 = pnand %p2116_p9, %p487_p3 }
 0x399   : > { %s2129_s12 = sld [smem:[#allocation7]] (!%p2117_p10) }
 0x39a   : > { %2120 = sbr.rel (%p2117_p10) target bundleno = 959 (0x3bf), region = 130  ;;  %s2453_s8 = sld [smem:[#allocation7 + $0x1]] (!%p2117_p10) }
 0x39f   : > { %v2121_v63 = vld [vmem:[#allocation3] sm:$0x1]  ;;  %v2124_v0 = vld [vmem:[#allocation3 + $0x1] sm:$0x1]  ;;  %v2132_v7 = vstv %s2129_s12  ;;  %vm2135_vm10 = vcmask 0  }
 0x3a0   : > { %v2122_v1 = vmul.f32 0.00048828125, %v2121_v63  ;;  %v2125_v2 = vmul.f32 0.00048828125, %v2124_v0  ;;  %v2139_v12 = vstv %s2453_s8 }
 0x3a2   : > { %v2126_v3 = vmul.f32 %v2122_v1, %v2122_v1 }
 0x3a4   : > { %v2127_v4 = vsub.f32 %v2125_v2, %v2126_v3 }
 0x3a6   : > { %v2128_v5 = vmax.f32 %v2127_v4, 0.0 }
 0x3a8   : > { %v2130_v6 = vadd.f32 1e-05, %v2128_v5 }
 0x3aa   : > { %2584 = vrsqrt.f32 %v2130_v6 }
 0x3b7   : > { %v2585_v8 = vpop.eup %2584 }
 0x3b8   : > { %v2133_v9 = vmul.f32 %v2585_v8, %v2132_v7 }
 0x3ba   : > { %2136 = vst.msk [vmem:[#allocation3 + $0x2] sm:$0x1] %vm2135_vm10, %v2133_v9  ;;  %v2138_v13 = vmul.f32 %v2133_v9, %v2122_v1 }
 0x3bc   : > { %v2140_v10 = vsub.f32 %v2139_v12, %v2138_v13 }
 0x3be   : > { %2142 = vst.msk [vmem:[#allocation3 + $0x3] sm:$0x1] %vm2135_vm10, %v2140_v10 }
 0x3bf PF: > { %p2454_p12 = scmp.ne.s32.totalorder %s2684_s20, 2 }
 0x3c0   : > { %s2150_s15 = sshra.s32 (!%p2454_p12), %s2416_s17, 7 }
 0x3c1   : > { %2145 = sbr.rel (%p2454_p12) target bundleno = 1128 (0x468), region = 134  ;;  %s2455_s13 = sshll.u32 (!%p2454_p12), %s2150_s15, 1 }
 0x3c2   : > { %s2153_s11 = scalar_lea.vmem (!%p2454_p12), [#allocation4], %s2455_s13 }
 0x3c6   : > { %v2147_v14 = vld [vmem:[#allocation3 + $0x2] sm:$0x1]  ;;  %v2704_v15 = vmov 0   ;;  %v2149_v16 = vld [vmem:[#allocation3 + $0x3] sm:$0x1]  ;;  %v2160_v17 = vlaneseq  ;;  %v2179_v38 = vld [vmem:[%s2915_s9] sm:$0xff] }
 0x3c7   : > { %2586 = vset.pattern.permute.xlu0 %v2704_v15  ;;  %v2154_v22 = vld [vmem:[%s2153_s11] ss:$2 sm:$0xf]  ;;  %v2456_v11 = vld [vmem:[%s2153_s11 + $0x1] ss:$2 sm:$0xf] }
 0x3c8   : > { %2157 = vperm.xlu0 %2586, %v2147_v14   ;;  %v2161_v18 = vshrl.u32 %v2160_v17, 7  ;;  %v2180_v39 = vld [vmem:[%s2915_s9 + $0x8] sm:$0xff]  ;;  %v2181_v41 = vld [vmem:[%s2915_s9 + $0x10] sm:$0xff]  ;;  %v2182_v28 = vld [vmem:[%s2915_s9 + $0x18] sm:$0xff] }
 0x3c9   : > { %v2457_v42 = vld [vmem:[%s2915_s9 + $0x20] sm:$0xff]  ;;  %v2458_v43 = vld [vmem:[%s2915_s9 + $0x28] sm:$0xff]  ;;  %v2459_v46 = vld [vmem:[%s2915_s9 + $0x30] sm:$0xff] }
 0x3ca   : > { %v2162_v19 = vsub.s32 0, %v2161_v18  ;;  %v2190_v32 = vsub.s32 1, %v2161_v18  ;;  %v2194_v34 = vsub.s32 2, %v2161_v18  ;;  %v2198_v35 = vsub.s32 3, %v2161_v18  ;;  %v2460_v47 = vld [vmem:[%s2915_s9 + $0x38] sm:$0xff] }
 0x3cc   : > { %2167 = vperm.xlu0 %2586, %v2149_v16  }
 0x443   : > { %v2158_v20 = vpop.permute.xlu0 %2157 }
 0x444   : > { %v2163_v21 = vrot.slane %v2158_v20, %v2162_v19 }
 0x446   : > { %v2164_v44 = vmul.f32 %v2163_v21, %v2154_v22  ;;  %v2214_v45 = vmul.f32 %v2456_v11, %v2163_v21 }
 0x447   : > { %v2168_v27 = vpop.permute.xlu0 %2167 }
 0x448   : > { %v2173_v23 = vrot.slane %v2168_v27, %v2162_v19 }
 0x44a   : > { %v2174_v24 = vadd.f32 %v2173_v23, %v2164_v44  ;;  %v2215_v25 = vadd.f32 %v2214_v45, %v2173_v23 }
 0x44c   : > { %v2175_v26 = vmul.f32 0.5, %v2174_v24  ;;  %v2216_v29 = vmul.f32 0.5, %v2215_v25 }
 0x44e   : > { %2587 = vtanh.f32 %v2175_v26 }
 0x44f   : > { %2589 = vtanh.f32 %v2216_v29 }
 0x45b   : > { %v2588_v30 = vpop.eup %2587 }
 0x45c   : > { %v2590_v31 = vpop.eup %2589  ;;  %v2177_v36 = vadd.f32 1.0, %v2588_v30 }
 0x45d   : > { %v2218_v37 = vadd.f32 1.0, %v2590_v31 }
 0x45e   : > { %v2178_v40 = vmul.f32 0.5, %v2177_v36 }
 0x45f   : > { %v2219_v33 = vmul.f32 0.5, %v2218_v37 }
 0x460   : > { %v2187_v48 = vrot.slane %v2178_v40, %v2162_v19  ;;  %v2191_v49 = vrot.slane %v2178_v40, %v2190_v32  ;;  %v2195_v50 = vrot.slane %v2178_v40, %v2194_v34  ;;  %v2199_v51 = vrot.slane %v2178_v40, %v2198_v35 }
 0x461   : > { %v2229_v52 = vrot.slane %v2219_v33, %v2162_v19  ;;  %v2233_v53 = vrot.slane %v2219_v33, %v2190_v32  ;;  %v2237_v54 = vrot.slane %v2219_v33, %v2194_v34  ;;  %v2241_v55 = vrot.slane %v2219_v33, %v2198_v35 }
 0x462   : > { %v2204_v57 = vmul.f32 %v2187_v48, %v2179_v38  ;;  %v2205_v58 = vmul.f32 %v2191_v49, %v2180_v39  ;;  %v2206_v59 = vmul.f32 %v2195_v50, %v2181_v41  ;;  %v2207_v60 = vmul.f32 %v2199_v51, %v2182_v28 }
 0x463   : > { %v2246_v56 = vmul.f32 %v2457_v42, %v2229_v52  ;;  %v2247_v61 = vmul.f32 %v2458_v43, %v2233_v53  ;;  %v2248_v62 = vmul.f32 %v2459_v46, %v2237_v54  ;;  %v2249_v63 = vmul.f32 %v2460_v47, %v2241_v55 }
 0x464   : > { %2208 = vst [vmem:[%s2927_s26] sm:$0xff] %v2204_v57  ;;  %2209 = vst [vmem:[%s2927_s26 + $0x8] sm:$0xff] %v2205_v58 }
 0x465   : > { %2210 = vst [vmem:[%s2927_s26 + $0x10] sm:$0xff] %v2206_v59  ;;  %2211 = vst [vmem:[%s2927_s26 + $0x18] sm:$0xff] %v2207_v60 }
 0x466   : > { %2461 = vst [vmem:[%s2927_s26 + $0x20] sm:$0xff] %v2246_v56  ;;  %2462 = vst [vmem:[%s2927_s26 + $0x28] sm:$0xff] %v2247_v61 }
 0x467   : > { %2463 = vst [vmem:[%s2927_s26 + $0x30] sm:$0xff] %v2248_v62  ;;  %2464 = vst [vmem:[%s2927_s26 + $0x38] sm:$0xff] %v2249_v63 }
 0x468 PF: > { %p3189_p13 = scmp.ne.s32.totalorder %s3177_s24, 0 }
 0x469   : > { %s3190_s17 = sld [smem:[#allocation21_spill]] (%p3189_p13) }
 0x46a   : > { %2261 = sbr.rel (!%p3189_p13) target bundleno = 1142 (0x476), region = 138 }
 0x46b   : > { %v2279_v0 = vld [vmem:[%s2927_s26] sm:$0xff] (%p3189_p13)  ;;  %v2281_v1 = vld [vmem:[%s2927_s26 + $0x8] sm:$0xff] (%p3189_p13) }
 0x46c   : > { %v2283_v2 = vld [vmem:[%s2927_s26 + $0x10] sm:$0xff] (%p3189_p13)  ;;  %v2285_v3 = vld [vmem:[%s2927_s26 + $0x18] sm:$0xff] (%p3189_p13) }
 0x46d   : > { %v2287_v4 = vld [vmem:[%s2927_s26 + $0x20] sm:$0xff] (%p3189_p13)  ;;  %v2289_v5 = vld [vmem:[%s2927_s26 + $0x28] sm:$0xff] (%p3189_p13) }
 0x46e   : > { %v2291_v6 = vld [vmem:[%s2927_s26 + $0x30] sm:$0xff] (%p3189_p13)  ;;  %v2293_v7 = vld [vmem:[%s2927_s26 + $0x38] sm:$0xff] (%p3189_p13) }
 0x46f   : > { %s3212_s19 = smov (!%p2116_p9, %s2680_s19), 0 }
 0x470   : > { %s2472_s24 = sshll.u32 %s3212_s19, 5 }
 0x471   : > { %s2266_s28 = scalar_lea.vmem %s3190_s17, %s2472_s24 }
 0x472   : > { %2280 = vst [vmem:[%s2266_s28] sm:$0xff] %v2279_v0  ;;  %2282 = vst [vmem:[%s2266_s28 + $0x8] sm:$0xff] %v2281_v1 }
 0x473   : > { %2284 = vst [vmem:[%s2266_s28 + $0x10] sm:$0xff] %v2283_v2  ;;  %2286 = vst [vmem:[%s2266_s28 + $0x18] sm:$0xff] %v2285_v3 }
 0x474   : > { %2288 = vst [vmem:[%s2266_s28 + $0x40] sm:$0xff] %v2287_v4  ;;  %2290 = vst [vmem:[%s2266_s28 + $0x48] sm:$0xff] %v2289_v5 }
 0x475   : > { %2292 = vst [vmem:[%s2266_s28 + $0x50] sm:$0xff] %v2291_v6  ;;  %2294 = vst [vmem:[%s2266_s28 + $0x58] sm:$0xff] %v2293_v7 }
 0x476 PF: > { %s21_s23 = sadd.s32 1, %s2696_s23   ;;  %s3191_s19 = sld [smem:[#allocation16_spill]] }
 0x477   : > { %p18_p0 = scmp.ge.s32.totalorder %s21_s23, 8   ;;  %s3192_s26 = sld [smem:[#allocation14_spill]] }
 0x478   : > { %s3193_s30 = sld [smem:[#allocation15_spill]]  ;;  %s3197_s13 = smov %s2660_s14 }
 0x479   : > { %s3194_s20 = sld [smem:[#allocation11_spill]]  ;;  %s3199_s15 = smov %s2668_s16 }
 0x47a   : > { %s3195_s29 = sld [smem:[#allocation12_spill]]  ;;  %s3201_s17 = smov %s2676_s18 }
 0x47b   : > { %s3196_s22 = sld [smem:[#allocation13_spill]] }
 0x47c   : > { %s3198_s14 = smov %s3191_s19  ;;  %s3203_s19 = smov %s2688_s21 }
 0x47d   : > { %s3200_s16 = smov %s3192_s26  ;;  %20 = sbr.rel (!%p18_p0) target bundleno = 12 (0xc), region = 231 }
 0x47e   : > { %s3202_s18 = smov %s3193_s30 }
 0x480   : > { %s3204_s21 = smov %s3195_s29 }
 0x482   :  { %2310 = vsyncpa [#allocation8], 1 }
 0x483   :  { %2312 = vsyncpa [#allocation8 + $0x1], 1 }

</bundles_post_ra>
